<compile_context>
chip_gen: v7x
topology: tpu7x:2x2x1
jax: 0.10.0
libtpu: 0.0.40
codegen_flags: <defaults>
</compile_context>

<pallas_src>
import functools

import numpy as np
import jax
import jax.numpy as jnp
from jax import lax, random
from jax.experimental import pallas as pl
from jax.experimental.pallas import tpu as pltpu

# Tiles here are KiB-scale; 32 MiB scoped VMEM is safe on v5e/v6e/v7x.
_VMEM_LIMIT_BYTES = 32 * 1024 * 1024


# ------------------------------ fused kernel --------------------------------

def _resblock_kernel(x_ref, wh_ref, bh_ref, wa_ref, ba_ref, wb_ref, bb_ref,
                     wt_ref, bt_ref, o_ref, pad_a, pad_b, *, H, W, ic, has_proj):
    """Entire ResBlock for one image: rows = H*W on sublanes, channels on lanes."""
    HW = H * W
    x = x_ref[...]                                           # (HW, Cin) bf16

    # -- fused 1x1 heads: b1[0] | b2[0] | (projection shortcut) in one matmul
    head = jnp.dot(x, wh_ref[...], preferred_element_type=jnp.float32)
    head = head + bh_ref[...]
    h12 = jnp.maximum(head[:, :2 * ic], 0.0)                 # branch heads: ReLU
    if has_proj:
        s = head[:, 2 * ic:]                                 # Conv+BN shortcut (no ReLU)
    else:
        s = x.astype(jnp.float32)                            # identity shortcut

    # -- first 3x3 conv of BOTH branches: one K = 9*(2*ic) matmul (block-diag W)
    pad_a[...] = jnp.zeros_like(pad_a)
    pad_a[1:H + 1, 1:W + 1, :] = h12.reshape(H, W, 2 * ic)
    patch_a = jnp.concatenate(
        [pad_a[dy:dy + H, dx:dx + W, :].reshape(HW, 2 * ic)
         for dy in range(3) for dx in range(3)], axis=1)     # (HW, 18*ic)
    ga = jnp.dot(patch_a.astype(jnp.bfloat16), wa_ref[...],
                 preferred_element_type=jnp.float32)
    ga = jnp.maximum(ga + ba_ref[...], 0.0)                  # [g1 | g2a]  (HW, 2*ic)

    # -- branch-2 second 3x3 conv: one K = 9*ic matmul ------------------------
    pad_b[...] = jnp.zeros_like(pad_b)
    pad_b[1:H + 1, 1:W + 1, :] = ga[:, ic:].reshape(H, W, ic)
    patch_b = jnp.concatenate(
        [pad_b[dy:dy + H, dx:dx + W, :].reshape(HW, ic)
         for dy in range(3) for dx in range(3)], axis=1)     # (HW, 9*ic)
    g2 = jnp.dot(patch_b.astype(jnp.bfloat16), wb_ref[...],
                 preferred_element_type=jnp.float32)
    g2 = jnp.maximum(g2 + bb_ref[...], 0.0)                  # (HW, ic)

    # -- tail: both branch-final 1x1s (block-diag) + concat + shortcut + ReLU -
    hcat = jnp.concatenate([ga[:, :ic], g2], axis=1).astype(jnp.bfloat16)
    y = jnp.dot(hcat, wt_ref[...], preferred_element_type=jnp.float32)
    o_ref[...] = jnp.maximum(y + bt_ref[...] + s, 0.0).astype(o_ref.dtype)


# ------------------------------ wrapper --------------------------------------

def res_block_forward(x_nchw, params, stride):
    ic = params['b1'][0]['wk'].shape[1]                      # inter_channels
    has_proj = len(params['short']) > 0

    x = jnp.transpose(x_nchw, (0, 2, 3, 1))                  # NCHW -> NHWC
    xs = x[:, ::stride, ::stride, :]                         # 1x1 stride == subsample
    N, H, W, Cin = xs.shape
    HW = H * W
    if not has_proj:
        # Identity shortcut only valid in this configuration (mirrors PyTorch).
        assert stride == 1 and Cin == 4 * ic, (
            "identity shortcut requires stride==1 and in_channels == 4*inter_channels")
    x2d = xs.reshape(N, HW, Cin).astype(jnp.bfloat16)        # bf16 activation DMA

    # fused head weight [W_b1_0 | W_b2_0 | W_short], bf16; bias stays f32
    head_w = [params['b1'][0]['wk'], params['b2'][0]['wk']]
    head_b = [params['b1'][0]['bk'], params['b2'][0]['bk']]
    if has_proj:
        head_w.append(params['short'][0]['wk'])
        head_b.append(params['short'][0]['bk'])
    wh = jnp.concatenate(head_w, axis=1).astype(jnp.bfloat16)      # (Cin, hk)
    bh = jnp.concatenate(head_b).reshape(1, -1)
    hk = wh.shape[1]

    # block-diagonal 3x3 weight for both branches' first 3x3 conv
    w1 = params['b1'][1]['wk']                               # (9, ic, ic)
    w2 = params['b2'][1]['wk']                               # (9, ic, ic)
    z9 = jnp.zeros_like(w1)
    wa = jnp.concatenate([jnp.concatenate([w1, z9], axis=2),
                          jnp.concatenate([z9, w2], axis=2)], axis=1)  # (9,2ic,2ic)
    wa = wa.reshape(9 * 2 * ic, 2 * ic).astype(jnp.bfloat16)
    ba = jnp.concatenate([params['b1'][1]['bk'], params['b2'][1]['bk']]).reshape(1, -1)

    # branch-2 second 3x3 conv weight
    wb = params['b2'][2]['wk'].reshape(9 * ic, ic).astype(jnp.bfloat16)
    bb = params['b2'][2]['bk'].reshape(1, -1)

    # block-diagonal tail (both branch-final 1x1 convs)
    # TODO(synk): for large inter_channels split into two dots writing adjacent
    # lane slabs instead of multiplying a half-zero block-diagonal weight.
    t1 = params['b1'][2]['wk']                               # (ic, 2*ic)
    t2 = params['b2'][3]['wk']                               # (ic, 2*ic)
    zt = jnp.zeros_like(t1)
    wt = jnp.concatenate([jnp.concatenate([t1, zt], axis=1),
                          jnp.concatenate([zt, t2], axis=1)], axis=0)  # (2ic, 4ic)
    wt = wt.astype(jnp.bfloat16)
    bt = jnp.concatenate([params['b1'][2]['bk'], params['b2'][3]['bk']]).reshape(1, -1)

    Cout = 4 * ic
    kernel = functools.partial(_resblock_kernel, H=H, W=W, ic=ic, has_proj=has_proj)
    flops = 2 * N * HW * (Cin * hk + 18 * ic * 2 * ic + 9 * ic * ic + 2 * ic * Cout)
    bytes_accessed = (2 * N * HW * Cin + 4 * N * HW * Cout
                      + 2 * (Cin * hk + 18 * ic * 2 * ic + 9 * ic * ic + 2 * ic * Cout)
                      + 4 * (hk + 2 * ic + ic + Cout))

    out2d = pl.pallas_call(
        kernel,
        out_shape=jax.ShapeDtypeStruct((N, HW, Cout), jnp.float32),
        grid=(N,),
        in_specs=[
            pl.BlockSpec((None, HW, Cin), lambda n: (n, 0, 0)),
            pl.BlockSpec((Cin, hk), lambda n: (0, 0)),
            pl.BlockSpec((1, hk), lambda n: (0, 0)),
            pl.BlockSpec((18 * ic, 2 * ic), lambda n: (0, 0)),
            pl.BlockSpec((1, 2 * ic), lambda n: (0, 0)),
            pl.BlockSpec((9 * ic, ic), lambda n: (0, 0)),
            pl.BlockSpec((1, ic), lambda n: (0, 0)),
            pl.BlockSpec((2 * ic, Cout), lambda n: (0, 0)),
            pl.BlockSpec((1, Cout), lambda n: (0, 0)),
        ],
        out_specs=pl.BlockSpec((None, HW, Cout), lambda n: (n, 0, 0)),
        scratch_shapes=[
            pltpu.VMEM((H + 2, W + 2, 2 * ic), jnp.float32),   # padded [h1|h2]
            pltpu.VMEM((H + 2, W + 2, ic), jnp.float32),       # padded g2a
        ],
        compiler_params=pltpu.CompilerParams(
            dimension_semantics=("parallel",),
            vmem_limit_bytes=_VMEM_LIMIT_BYTES),
        cost_estimate=pl.CostEstimate(
            flops=flops, transcendentals=0, bytes_accessed=bytes_accessed),
    )(x2d, wh, bh, wa, ba, wb, bb, wt, bt)

    out = out2d.reshape(N, H, W, Cout)
    return jnp.transpose(out, (0, 3, 1, 2))                   # NHWC -> NCHW


# ------------------------------ reference (pure JAX) --------------------------

def _conv_ref(x, w, b, stride, pad):
    y = lax.conv_general_dilated(
        x, w, (stride, stride), [(pad, pad), (pad, pad)],
        dimension_numbers=('NCHW', 'OIHW', 'NCHW'))
    return y + b[None, :, None, None]


def ref_forward(x, params, stride):
    p = params['b1']
    h = jax.nn.relu(_conv_ref(x, p[0]['w'], p[0]['b'], stride, 0))
    h = jax.nn.relu(_conv_ref(h, p[1]['w'], p[1]['b'], 1, 1))
    o1 = _conv_ref(h, p[2]['w'], p[2]['b'], 1, 0)
    p = params['b2']
    h = jax.nn.relu(_conv_ref(x, p[0]['w'], p[0]['b'], stride, 0))
    h = jax.nn.relu(_conv_ref(h, p[1]['w'], p[1]['b'], 1, 1))
    h = jax.nn.relu(_conv_ref(h, p[2]['w'], p[2]['b'], 1, 1))
    o2 = _conv_ref(h, p[3]['w'], p[3]['b'], 1, 0)
    if params['short']:
        p = params['short'][0]
        s = _conv_ref(x, p['w'], p['b'], stride, 0)
    else:
        s = x
    return jax.nn.relu(jnp.concatenate([o1, o2], axis=1) + s)


# ------------------------------ params ----------------------------------------

def make_conv_bn(key, cin, cout, ksize):
    """Deterministic Conv2d + eval-mode BatchNorm2d params with BN folded in."""
    k1, k2, k3, k4, k5, k6 = random.split(key, 6)
    w = random.normal(k1, (cout, cin, ksize, ksize), jnp.float32) * 0.2
    b = random.normal(k2, (cout,), jnp.float32) * 0.1
    gamma = 1.0 + 0.1 * random.normal(k3, (cout,), jnp.float32)
    beta = 0.1 * random.normal(k4, (cout,), jnp.float32)
    mean = 0.1 * random.normal(k5, (cout,), jnp.float32)
    var = 0.5 + 0.5 * jnp.abs(random.normal(k6, (cout,), jnp.float32))
    eps = 1e-5
    scale = gamma / jnp.sqrt(var + eps)
    wf = w * scale[:, None, None, None]                       # folded weight (OIHW)
    bf = (b - mean) * scale + beta                            # folded bias
    if ksize == 1:
        wk = wf[:, :, 0, 0].T                                 # (Cin, Cout)
    else:
        wk = jnp.transpose(wf, (2, 3, 1, 0)).reshape(ksize * ksize, cin, cout)
    return {'w': wf, 'b': bf, 'wk': wk, 'bk': bf}


def make_params(key, in_channels, inter_channels, stride):
    keys = random.split(key, 9)
    params = {
        'b1': [make_conv_bn(keys[0], in_channels, inter_channels, 1),
               make_conv_bn(keys[1], inter_channels, inter_channels, 3),
               make_conv_bn(keys[2], inter_channels, inter_channels * 2, 1)],
        'b2': [make_conv_bn(keys[3], in_channels, inter_channels, 1),
               make_conv_bn(keys[4], inter_channels, inter_channels, 3),
               make_conv_bn(keys[5], inter_channels, inter_channels, 3),
               make_conv_bn(keys[6], inter_channels, inter_channels * 2, 1)],
        'short': [],
    }
    if stride != 1 or in_channels != inter_channels * 4:
        params['short'] = [make_conv_bn(keys[7], in_channels, inter_channels * 4, 1)]
    return params


# ------------------------------ main -------------------------------------------

if __name__ == "__main__":
    fwd = jax.jit(res_block_forward, static_argnums=2)

    # ---- config 1: projection shortcut (stride=2) -------------------------
    in_channels, inter_channels, stride = 8, 4, 2
    N, H, W = 2, 16, 16
    key = random.PRNGKey(0)
    kx, kp, kx2, kp2 = random.split(key, 4)
    x = random.normal(kx, (N, in_channels, H, W), jnp.float32)
    params = make_params(kp, in_channels, inter_channels, stride)

    out = jax.block_until_ready(fwd(x, params, stride))
    ref = jax.block_until_ready(ref_forward(x, params, stride))
    assert out.shape == (N, inter_channels * 4, H // stride, W // stride), out.shape
    # bf16 MXU inputs with f32 accumulation -> loosened tolerance.
    np.testing.assert_allclose(np.asarray(out), np.asarray(ref), rtol=5e-2, atol=5e-2)

    # ---- config 2: identity shortcut (stride=1, in_channels == 4*ic) -------
    in_channels2, stride2 = 16, 1
    x2 = random.normal(kx2, (N, in_channels2, H, W), jnp.float32)
    params2 = make_params(kp2, in_channels2, inter_channels, stride2)
    out2 = jax.block_until_ready(fwd(x2, params2, stride2))
    ref2 = jax.block_until_ready(ref_forward(x2, params2, stride2))
    assert out2.shape == (N, inter_channels * 4, H, W), out2.shape
    np.testing.assert_allclose(np.asarray(out2), np.asarray(ref2), rtol=5e-2, atol=5e-2)

    print("KERNEL_OK")
</pallas_src>

<mosaic_0001>
module attributes {stable_mosaic.version = 11 : i64} {
  func.func @_resblock_kernel(%arg0: i32, %arg1: memref<1x64x8xbf16, #tpu.memory_space<vmem>>, %arg2: memref<8x24xbf16, #tpu.memory_space<vmem>>, %arg3: memref<1x24xf32, #tpu.memory_space<vmem>>, %arg4: memref<72x8xbf16, #tpu.memory_space<vmem>>, %arg5: memref<1x8xf32, #tpu.memory_space<vmem>>, %arg6: memref<36x4xbf16, #tpu.memory_space<vmem>>, %arg7: memref<1x4xf32, #tpu.memory_space<vmem>>, %arg8: memref<8x16xbf16, #tpu.memory_space<vmem>>, %arg9: memref<1x16xf32, #tpu.memory_space<vmem>>, %arg10: memref<1x64x16xf32, #tpu.memory_space<vmem>>, %arg11: memref<10x10x8xf32, #tpu.memory_space<vmem>>, %arg12: memref<10x10x4xf32, #tpu.memory_space<vmem>>) attributes {dimension_semantics = [#tpu.dimension_semantics<parallel>], iteration_bounds = array<i64: 2>, scalar_prefetch = 0 : i64, scratch_operands = 2 : i64, tpu.core_type = #tpu.core_type<tc>, window_params = [{transform_indices = @transform_0, window_bounds = array<i64: 1, 64, 8>}, {pipeline_mode = #tpu.pipeline_mode<synchronous>, transform_indices = @transform_1, window_bounds = array<i64: 8, 24>}, {pipeline_mode = #tpu.pipeline_mode<synchronous>, transform_indices = @transform_2, window_bounds = array<i64: 1, 24>}, {pipeline_mode = #tpu.pipeline_mode<synchronous>, transform_indices = @transform_3, window_bounds = array<i64: 72, 8>}, {pipeline_mode = #tpu.pipeline_mode<synchronous>, transform_indices = @transform_4, window_bounds = array<i64: 1, 8>}, {pipeline_mode = #tpu.pipeline_mode<synchronous>, transform_indices = @transform_5, window_bounds = array<i64: 36, 4>}, {pipeline_mode = #tpu.pipeline_mode<synchronous>, transform_indices = @transform_6, window_bounds = array<i64: 1, 4>}, {pipeline_mode = #tpu.pipeline_mode<synchronous>, transform_indices = @transform_7, window_bounds = array<i64: 8, 16>}, {pipeline_mode = #tpu.pipeline_mode<synchronous>, transform_indices = @transform_8, window_bounds = array<i64: 1, 16>}, {transform_indices = @transform_9, window_bounds = array<i64: 1, 64, 16>}]} {
    %c0 = arith.constant 0 : index
    %c0_0 = arith.constant 0 : index
    %c0_1 = arith.constant 0 : index
    %0 = vector.load %arg1[%c0, %c0_0, %c0_1] : memref<1x64x8xbf16, #tpu.memory_space<vmem>>, vector<1x64x8xbf16>
    %1 = vector.shape_cast %0 : vector<1x64x8xbf16> to vector<64x8xbf16>
    %c0_2 = arith.constant 0 : index
    %c0_3 = arith.constant 0 : index
    %2 = vector.load %arg2[%c0_2, %c0_3] : memref<8x24xbf16, #tpu.memory_space<vmem>>, vector<8x24xbf16>
    %cst = arith.constant dense<0.000000e+00> : vector<64x24xf32>
    %3 = tpu.matmul %1, %2, %cst {dimension_numbers = #tpu.dot_dimension_numbers<[1], [0], [0], [1], [0, 0, 1, 1], [], []>} : vector<64x8xbf16>, vector<8x24xbf16>, vector<64x24xf32> -> vector<64x24xf32>
    %c0_4 = arith.constant 0 : index
    %c0_5 = arith.constant 0 : index
    %4 = vector.load %arg3[%c0_4, %c0_5] : memref<1x24xf32, #tpu.memory_space<vmem>>, vector<1x24xf32>
    %5 = vector.broadcast %4 : vector<1x24xf32> to vector<64x24xf32>
    %6 = arith.addf %3, %5 : vector<64x24xf32>
    %7 = vector.extract_strided_slice %6 {offsets = [0, 0], sizes = [64, 8], strides = [1, 1]} : vector<64x24xf32> to vector<64x8xf32>
    %cst_6 = arith.constant 0.000000e+00 : f32
    %8 = vector.broadcast %cst_6 : f32 to vector<64x8xf32>
    %9 = arith.maximumf %7, %8 : vector<64x8xf32>
    %10 = vector.extract_strided_slice %6 {offsets = [0, 8], sizes = [64, 16], strides = [1, 1]} : vector<64x24xf32> to vector<64x16xf32>
    %cst_7 = arith.constant 0.000000e+00 : f32
    %11 = vector.broadcast %cst_7 : f32 to vector<10x10x8xf32>
    %c0_8 = arith.constant 0 : index
    %c0_9 = arith.constant 0 : index
    %c0_10 = arith.constant 0 : index
    %12 = vector.load %arg11[%c0_8, %c0_9, %c0_10] : memref<10x10x8xf32, #tpu.memory_space<vmem>>, vector<10x10x8xf32>
    tpu.vector_store %arg11[%c0_8, %c0_9, %c0_10], %11 {strides = array<i32>} : memref<10x10x8xf32, #tpu.memory_space<vmem>>, vector<10x10x8xf32>,
    %13 = vector.shape_cast %9 : vector<64x8xf32> to vector<8x8x8xf32>
    %c1 = arith.constant 1 : index
    %c1_11 = arith.constant 1 : index
    %c0_12 = arith.constant 0 : index
    %14 = vector.load %arg11[%c1, %c1_11, %c0_12] : memref<10x10x8xf32, #tpu.memory_space<vmem>>, vector<8x8x8xf32>
    tpu.vector_store %arg11[%c1, %c1_11, %c0_12], %13 {strides = array<i32>} : memref<10x10x8xf32, #tpu.memory_space<vmem>>, vector<8x8x8xf32>,
    %c0_13 = arith.constant 0 : index
    %c0_14 = arith.constant 0 : index
    %c0_15 = arith.constant 0 : index
    %15 = vector.load %arg11[%c0_13, %c0_14, %c0_15] : memref<10x10x8xf32, #tpu.memory_space<vmem>>, vector<8x8x8xf32>
    %16 = vector.shape_cast %15 : vector<8x8x8xf32> to vector<64x8xf32>
    %c0_16 = arith.constant 0 : index
    %c1_17 = arith.constant 1 : index
    %c0_18 = arith.constant 0 : index
    %17 = vector.load %arg11[%c0_16, %c1_17, %c0_18] : memref<10x10x8xf32, #tpu.memory_space<vmem>>, vector<8x8x8xf32>
    %18 = vector.shape_cast %17 : vector<8x8x8xf32> to vector<64x8xf32>
    %c0_19 = arith.constant 0 : index
    %c2 = arith.constant 2 : index
    %c0_20 = arith.constant 0 : index
    %19 = vector.load %arg11[%c0_19, %c2, %c0_20] : memref<10x10x8xf32, #tpu.memory_space<vmem>>, vector<8x8x8xf32>
    %20 = vector.shape_cast %19 : vector<8x8x8xf32> to vector<64x8xf32>
    %c1_21 = arith.constant 1 : index
    %c0_22 = arith.constant 0 : index
    %c0_23 = arith.constant 0 : index
    %21 = vector.load %arg11[%c1_21, %c0_22, %c0_23] : memref<10x10x8xf32, #tpu.memory_space<vmem>>, vector<8x8x8xf32>
    %22 = vector.shape_cast %21 : vector<8x8x8xf32> to vector<64x8xf32>
    %c1_24 = arith.constant 1 : index
    %c1_25 = arith.constant 1 : index
    %c0_26 = arith.constant 0 : index
    %23 = vector.load %arg11[%c1_24, %c1_25, %c0_26] : memref<10x10x8xf32, #tpu.memory_space<vmem>>, vector<8x8x8xf32>
    %24 = vector.shape_cast %23 : vector<8x8x8xf32> to vector<64x8xf32>
    %c1_27 = arith.constant 1 : index
    %c2_28 = arith.constant 2 : index
    %c0_29 = arith.constant 0 : index
    %25 = vector.load %arg11[%c1_27, %c2_28, %c0_29] : memref<10x10x8xf32, #tpu.memory_space<vmem>>, vector<8x8x8xf32>
    %26 = vector.shape_cast %25 : vector<8x8x8xf32> to vector<64x8xf32>
    %c2_30 = arith.constant 2 : index
    %c0_31 = arith.constant 0 : index
    %c0_32 = arith.constant 0 : index
    %27 = vector.load %arg11[%c2_30, %c0_31, %c0_32] : memref<10x10x8xf32, #tpu.memory_space<vmem>>, vector<8x8x8xf32>
    %28 = vector.shape_cast %27 : vector<8x8x8xf32> to vector<64x8xf32>
    %c2_33 = arith.constant 2 : index
    %c1_34 = arith.constant 1 : index
    %c0_35 = arith.constant 0 : index
    %29 = vector.load %arg11[%c2_33, %c1_34, %c0_35] : memref<10x10x8xf32, #tpu.memory_space<vmem>>, vector<8x8x8xf32>
    %30 = vector.shape_cast %29 : vector<8x8x8xf32> to vector<64x8xf32>
    %c2_36 = arith.constant 2 : index
    %c2_37 = arith.constant 2 : index
    %c0_38 = arith.constant 0 : index
    %31 = vector.load %arg11[%c2_36, %c2_37, %c0_38] : memref<10x10x8xf32, #tpu.memory_space<vmem>>, vector<8x8x8xf32>
    %32 = vector.shape_cast %31 : vector<8x8x8xf32> to vector<64x8xf32>
    %33 = tpu.concatenate %16, %18, %20, %22, %24, %26, %28, %30, %32 in 1 : vector<64x8xf32>, vector<64x8xf32>, vector<64x8xf32>, vector<64x8xf32>, vector<64x8xf32>, vector<64x8xf32>, vector<64x8xf32>, vector<64x8xf32>, vector<64x8xf32> -> vector<64x72xf32>
    %34 = arith.truncf %33 : vector<64x72xf32> to vector<64x72xbf16>
    %c0_39 = arith.constant 0 : index
    %c0_40 = arith.constant 0 : index
    %35 = vector.load %arg4[%c0_39, %c0_40] : memref<72x8xbf16, #tpu.memory_space<vmem>>, vector<72x8xbf16>
    %cst_41 = arith.constant dense<0.000000e+00> : vector<64x8xf32>
    %36 = tpu.matmul %34, %35, %cst_41 {dimension_numbers = #tpu.dot_dimension_numbers<[1], [0], [0], [1], [0, 0, 1, 1], [], []>} : vector<64x72xbf16>, vector<72x8xbf16>, vector<64x8xf32> -> vector<64x8xf32>
    %c0_42 = arith.constant 0 : index
    %c0_43 = arith.constant 0 : index
    %37 = vector.load %arg5[%c0_42, %c0_43] : memref<1x8xf32, #tpu.memory_space<vmem>>, vector<1x8xf32>
    %38 = vector.broadcast %37 : vector<1x8xf32> to vector<64x8xf32>
    %39 = arith.addf %36, %38 : vector<64x8xf32>
    %cst_44 = arith.constant 0.000000e+00 : f32
    %40 = vector.broadcast %cst_44 : f32 to vector<64x8xf32>
    %41 = arith.maximumf %39, %40 : vector<64x8xf32>
    %cst_45 = arith.constant 0.000000e+00 : f32
    %42 = vector.broadcast %cst_45 : f32 to vector<10x10x4xf32>
    %c0_46 = arith.constant 0 : index
    %c0_47 = arith.constant 0 : index
    %c0_48 = arith.constant 0 : index
    %43 = vector.load %arg12[%c0_46, %c0_47, %c0_48] : memref<10x10x4xf32, #tpu.memory_space<vmem>>, vector<10x10x4xf32>
    tpu.vector_store %arg12[%c0_46, %c0_47, %c0_48], %42 {strides = array<i32>} : memref<10x10x4xf32, #tpu.memory_space<vmem>>, vector<10x10x4xf32>,
    %44 = vector.extract_strided_slice %41 {offsets = [0, 4], sizes = [64, 4], strides = [1, 1]} : vector<64x8xf32> to vector<64x4xf32>
    %45 = vector.shape_cast %44 : vector<64x4xf32> to vector<8x8x4xf32>
    %c1_49 = arith.constant 1 : index
    %c1_50 = arith.constant 1 : index
    %c0_51 = arith.constant 0 : index
    %46 = vector.load %arg12[%c1_49, %c1_50, %c0_51] : memref<10x10x4xf32, #tpu.memory_space<vmem>>, vector<8x8x4xf32>
    tpu.vector_store %arg12[%c1_49, %c1_50, %c0_51], %45 {strides = array<i32>} : memref<10x10x4xf32, #tpu.memory_space<vmem>>, vector<8x8x4xf32>,
    %c0_52 = arith.constant 0 : index
    %c0_53 = arith.constant 0 : index
    %c0_54 = arith.constant 0 : index
    %47 = vector.load %arg12[%c0_52, %c0_53, %c0_54] : memref<10x10x4xf32, #tpu.memory_space<vmem>>, vector<8x8x4xf32>
    %48 = vector.shape_cast %47 : vector<8x8x4xf32> to vector<64x4xf32>
    %c0_55 = arith.constant 0 : index
    %c1_56 = arith.constant 1 : index
    %c0_57 = arith.constant 0 : index
    %49 = vector.load %arg12[%c0_55, %c1_56, %c0_57] : memref<10x10x4xf32, #tpu.memory_space<vmem>>, vector<8x8x4xf32>
    %50 = vector.shape_cast %49 : vector<8x8x4xf32> to vector<64x4xf32>
    %c0_58 = arith.constant 0 : index
    %c2_59 = arith.constant 2 : index
    %c0_60 = arith.constant 0 : index
    %51 = vector.load %arg12[%c0_58, %c2_59, %c0_60] : memref<10x10x4xf32, #tpu.memory_space<vmem>>, vector<8x8x4xf32>
    %52 = vector.shape_cast %51 : vector<8x8x4xf32> to vector<64x4xf32>
    %c1_61 = arith.constant 1 : index
    %c0_62 = arith.constant 0 : index
    %c0_63 = arith.constant 0 : index
    %53 = vector.load %arg12[%c1_61, %c0_62, %c0_63] : memref<10x10x4xf32, #tpu.memory_space<vmem>>, vector<8x8x4xf32>
    %54 = vector.shape_cast %53 : vector<8x8x4xf32> to vector<64x4xf32>
    %c1_64 = arith.constant 1 : index
    %c1_65 = arith.constant 1 : index
    %c0_66 = arith.constant 0 : index
    %55 = vector.load %arg12[%c1_64, %c1_65, %c0_66] : memref<10x10x4xf32, #tpu.memory_space<vmem>>, vector<8x8x4xf32>
    %56 = vector.shape_cast %55 : vector<8x8x4xf32> to vector<64x4xf32>
    %c1_67 = arith.constant 1 : index
    %c2_68 = arith.constant 2 : index
    %c0_69 = arith.constant 0 : index
    %57 = vector.load %arg12[%c1_67, %c2_68, %c0_69] : memref<10x10x4xf32, #tpu.memory_space<vmem>>, vector<8x8x4xf32>
    %58 = vector.shape_cast %57 : vector<8x8x4xf32> to vector<64x4xf32>
    %c2_70 = arith.constant 2 : index
    %c0_71 = arith.constant 0 : index
    %c0_72 = arith.constant 0 : index
    %59 = vector.load %arg12[%c2_70, %c0_71, %c0_72] : memref<10x10x4xf32, #tpu.memory_space<vmem>>, vector<8x8x4xf32>
    %60 = vector.shape_cast %59 : vector<8x8x4xf32> to vector<64x4xf32>
    %c2_73 = arith.constant 2 : index
    %c1_74 = arith.constant 1 : index
    %c0_75 = arith.constant 0 : index
    %61 = vector.load %arg12[%c2_73, %c1_74, %c0_75] : memref<10x10x4xf32, #tpu.memory_space<vmem>>, vector<8x8x4xf32>
    %62 = vector.shape_cast %61 : vector<8x8x4xf32> to vector<64x4xf32>
    %c2_76 = arith.constant 2 : index
    %c2_77 = arith.constant 2 : index
    %c0_78 = arith.constant 0 : index
    %63 = vector.load %arg12[%c2_76, %c2_77, %c0_78] : memref<10x10x4xf32, #tpu.memory_space<vmem>>, vector<8x8x4xf32>
    %64 = vector.shape_cast %63 : vector<8x8x4xf32> to vector<64x4xf32>
    %65 = tpu.concatenate %48, %50, %52, %54, %56, %58, %60, %62, %64 in 1 : vector<64x4xf32>, vector<64x4xf32>, vector<64x4xf32>, vector<64x4xf32>, vector<64x4xf32>, vector<64x4xf32>, vector<64x4xf32>, vector<64x4xf32>, vector<64x4xf32> -> vector<64x36xf32>
    %66 = arith.truncf %65 : vector<64x36xf32> to vector<64x36xbf16>
    %c0_79 = arith.constant 0 : index
    %c0_80 = arith.constant 0 : index
    %67 = vector.load %arg6[%c0_79, %c0_80] : memref<36x4xbf16, #tpu.memory_space<vmem>>, vector<36x4xbf16>
    %cst_81 = arith.constant dense<0.000000e+00> : vector<64x4xf32>
    %68 = tpu.matmul %66, %67, %cst_81 {dimension_numbers = #tpu.dot_dimension_numbers<[1], [0], [0], [1], [0, 0, 1, 1], [], []>} : vector<64x36xbf16>, vector<36x4xbf16>, vector<64x4xf32> -> vector<64x4xf32>
    %c0_82 = arith.constant 0 : index
    %c0_83 = arith.constant 0 : index
    %69 = vector.load %arg7[%c0_82, %c0_83] : memref<1x4xf32, #tpu.memory_space<vmem>>, vector<1x4xf32>
    %70 = vector.broadcast %69 : vector<1x4xf32> to vector<64x4xf32>
    %71 = arith.addf %68, %70 : vector<64x4xf32>
    %cst_84 = arith.constant 0.000000e+00 : f32
    %72 = vector.broadcast %cst_84 : f32 to vector<64x4xf32>
    %73 = arith.maximumf %71, %72 : vector<64x4xf32>
    %74 = vector.extract_strided_slice %41 {offsets = [0, 0], sizes = [64, 4], strides = [1, 1]} : vector<64x8xf32> to vector<64x4xf32>
    %75 = tpu.concatenate %74, %73 in 1 : vector<64x4xf32>, vector<64x4xf32> -> vector<64x8xf32>
    %76 = arith.truncf %75 : vector<64x8xf32> to vector<64x8xbf16>
    %c0_85 = arith.constant 0 : index
    %c0_86 = arith.constant 0 : index
    %77 = vector.load %arg8[%c0_85, %c0_86] : memref<8x16xbf16, #tpu.memory_space<vmem>>, vector<8x16xbf16>
    %cst_87 = arith.constant dense<0.000000e+00> : vector<64x16xf32>
    %78 = tpu.matmul %76, %77, %cst_87 {dimension_numbers = #tpu.dot_dimension_numbers<[1], [0], [0], [1], [0, 0, 1, 1], [], []>} : vector<64x8xbf16>, vector<8x16xbf16>, vector<64x16xf32> -> vector<64x16xf32>
    %c0_88 = arith.constant 0 : index
    %c0_89 = arith.constant 0 : index
    %79 = vector.load %arg9[%c0_88, %c0_89] : memref<1x16xf32, #tpu.memory_space<vmem>>, vector<1x16xf32>
    %80 = vector.broadcast %79 : vector<1x16xf32> to vector<64x16xf32>
    %81 = arith.addf %78, %80 : vector<64x16xf32>
    %82 = arith.addf %81, %10 : vector<64x16xf32>
    %cst_90 = arith.constant 0.000000e+00 : f32
    %83 = vector.broadcast %cst_90 : f32 to vector<64x16xf32>
    %84 = arith.maximumf %82, %83 : vector<64x16xf32>
    %c0_91 = arith.constant 0 : index
    %c0_92 = arith.constant 0 : index
    %c0_93 = arith.constant 0 : index
    %85 = vector.load %arg10[%c0_91, %c0_92, %c0_93] : memref<1x64x16xf32, #tpu.memory_space<vmem>>, vector<1x64x16xf32>
    %86 = vector.shape_cast %85 : vector<1x64x16xf32> to vector<64x16xf32>
    %87 = vector.shape_cast %84 : vector<64x16xf32> to vector<1x64x16xf32>
    tpu.vector_store %arg10[%c0_91, %c0_92, %c0_93], %87 {strides = array<i32>} : memref<1x64x16xf32, #tpu.memory_space<vmem>>, vector<1x64x16xf32>,
    return
  }
  func.func @transform_0(%arg0: i32) -> (i32, i32, i32) {
    %c0_i32 = arith.constant 0 : i32
    %c0_i32_0 = arith.constant 0 : i32
    %c0_i32_1 = arith.constant 0 : i32
    return %arg0, %c0_i32, %c0_i32_0 : i32, i32, i32
  }
  func.func @transform_1(%arg0: i32) -> (i32, i32) {
    %c0_i32 = arith.constant 0 : i32
    %c0_i32_0 = arith.constant 0 : i32
    %c0_i32_1 = arith.constant 0 : i32
    return %c0_i32, %c0_i32_0 : i32, i32
  }
  func.func @transform_2(%arg0: i32) -> (i32, i32) {
    %c0_i32 = arith.constant 0 : i32
    %c0_i32_0 = arith.constant 0 : i32
    %c0_i32_1 = arith.constant 0 : i32
    return %c0_i32, %c0_i32_0 : i32, i32
  }
  func.func @transform_3(%arg0: i32) -> (i32, i32) {
    %c0_i32 = arith.constant 0 : i32
    %c0_i32_0 = arith.constant 0 : i32
    %c0_i32_1 = arith.constant 0 : i32
    return %c0_i32, %c0_i32_0 : i32, i32
  }
  func.func @transform_4(%arg0: i32) -> (i32, i32) {
    %c0_i32 = arith.constant 0 : i32
    %c0_i32_0 = arith.constant 0 : i32
    %c0_i32_1 = arith.constant 0 : i32
    return %c0_i32, %c0_i32_0 : i32, i32
  }
  func.func @transform_5(%arg0: i32) -> (i32, i32) {
    %c0_i32 = arith.constant 0 : i32
    %c0_i32_0 = arith.constant 0 : i32
    %c0_i32_1 = arith.constant 0 : i32
    return %c0_i32, %c0_i32_0 : i32, i32
  }
  func.func @transform_6(%arg0: i32) -> (i32, i32) {
    %c0_i32 = arith.constant 0 : i32
    %c0_i32_0 = arith.constant 0 : i32
    %c0_i32_1 = arith.constant 0 : i32
    return %c0_i32, %c0_i32_0 : i32, i32
  }
  func.func @transform_7(%arg0: i32) -> (i32, i32) {
    %c0_i32 = arith.constant 0 : i32
    %c0_i32_0 = arith.constant 0 : i32
    %c0_i32_1 = arith.constant 0 : i32
    return %c0_i32, %c0_i32_0 : i32, i32
  }
  func.func @transform_8(%arg0: i32) -> (i32, i32) {
    %c0_i32 = arith.constant 0 : i32
    %c0_i32_0 = arith.constant 0 : i32
    %c0_i32_1 = arith.constant 0 : i32
    return %c0_i32, %c0_i32_0 : i32, i32
  }
  func.func @transform_9(%arg0: i32) -> (i32, i32, i32) {
    %c0_i32 = arith.constant 0 : i32
    %c0_i32_0 = arith.constant 0 : i32
    %c0_i32_1 = arith.constant 0 : i32
    return %arg0, %c0_i32, %c0_i32_0 : i32, i32, i32
  }
}

</mosaic_0001>

<bundles_post_ra>
// kernel: res_block_forward.1
= control target key start
LH: loop header
LB: loop body
LE: loop exit
PB: predicated region body
PF: predicated region fallthrough
CT: control target
= control target key end

     0   :  { %14 = vsyncpa [#allocation5], 0  ;;  %s3197_s0 = inlined_call_operand.vmem [shape: bf16[2,64,8], index: 0, kind: input, shape index: {}]   ;;  %s3198_s1 = inlined_call_operand.vmem [shape: bf16[8,24], index: 1, kind: input, shape index: {}]   ;;  %s3199_s2 = inlined_call_operand.vmem [shape: f32[1,24], index: 2, kind: input, shape index: {}]   ;;  %s3200_s3 = inlined_call_operand.vmem [shape: bf16[72,8], index: 3, kind: input, shape index: {}]   ;;  %s3201_s4 = inlined_call_operand.vmem [shape: f32[1,8], index: 4, kind: input, shape index: {}]   ;;  %s3202_s5 = inlined_call_operand.vmem [shape: bf16[36,4], index: 5, kind: input, shape index: {}]   ;;  %s3203_s6 = inlined_call_operand.vmem [shape: f32[1,4], index: 6, kind: input, shape index: {}]   ;;  %s3204_s7 = inlined_call_operand.vmem [shape: bf16[8,16], index: 7, kind: input, shape index: {}]   ;;  %s3205_s8 = inlined_call_operand.vmem [shape: f32[1,16], index: 8, kind: input, shape index: {}]   ;;  %s3206_s9 = inlined_call_operand.hbm [shape: f32[2,64,16], index: 9, kind: output, shape index: {}]  }
   0x1   :  { %16 = vsyncpa [#allocation5 + $0x1], 0  ;;  %s2534_s30 = smov 0   ;;  %s2536_s10 = smov 0  }
   0x2   :  { %s2538_s11 = smov 0   ;;  %s2540_s12 = smov 0  }
   0x3 LB: > { %s2555_s13 = sadd.s32 4294967295, %s2465_s12   ;;  %s1868_s14 = sadd.s32 4294967294, %s2465_s12   ;;  %s2465_s12 = sphi %s2540_s12, %s3212_s12   ;;  %s2461_s11 = sphi %s2538_s11, %s3211_s11   ;;  %s2457_s10 = sphi %s2536_s10, %s3210_s10   ;;  %s2453_s30 = sphi %s2534_s30, %s3209_s30  }
   0x4   : > { %s2559_s15 = sadd.s32 1, %s2465_s12   ;;  %s223_s16 = sadd.s32 1, %s2461_s11 }
   0x5   : > { %s220_s17 = ssub.s32 %s2465_s12, %s2559_s15  ;;  %p233_p0 = scmp.ne.s32.totalorder %s2461_s11, %s2457_s10 }
   0x6   : > { %p221_p1 = scmp.eq.s32.totalorder %s220_s17, 0  ;;  %p234_p2 = scmp.eq.s32.totalorder %s2555_s13, 1 }
   0x7   : > { %p239_p3 = scmp.ne.s32.totalorder %s2457_s10, %s2453_s30  ;;  %p240_p4 = scmp.eq.s32.totalorder %s1868_s14, 1 }
   0x8   : > { %s2570_s18 = scalar_select %p221_p1, %s2461_s11, %s223_s16  }
   0x9   : > { %p2572_p5 = por %p234_p2, %p233_p0  ;;  %p2576_p6 = por %p240_p4, %p239_p3 }
   0xa   : > { %p1871_p7 = scmp.ge.s32.totalorder %s2465_s12, 1  ;;  %p290_p8 = scmp.lt.s32.totalorder %s2465_s12, 3 }
   0xc   : > { %p291_p9 = pnand %p1871_p7, %p290_p8 }
   0xd   : > { %v340_v0 = vld [vmem:[%s3198_s1] sm:$0xf] (!%p291_p9)  ;;  %vm381_vm0 = vcmask (!%p291_p9), 1043456   ;;  %p326_p10 = scmp.lt.s32.totalorder (!%p291_p9), %s2555_s13, 1  ;;  %vm368_vm1 = vcmask (!%p291_p9), 64512   ;;  %vm459_vm2 = vcmask (!%p291_p9), 58368  }
   0xe   : > { %294 = sbr.rel (%p291_p9) target bundleno = 1516 (0x5ec), region = 56  ;;  %1992 = vmatprep.subr.msk.bf16.mxu1 (!%p291_p9), %vm381_vm0, %v340_v0  ;;  %v383_v1 = vsel (!%p291_p9), %vm381_vm0, %v340_v0, 0  ;;  %v2467_v6 = vmov (!%p291_p9), 0.0   ;;  %v1875_v7 = vld [vmem:[%s3199_s2] ss:$0 sm:$0xff] (!%p291_p9)  ;;  %s2468_s14 = smov (!%p291_p9), 16  }
   0xf   : > { %1941 = vmatpush3.bf16.msra.mxu1 (!%p291_p9), %v383_v1  ;;  %465 = vst.msk [vmem:[#allocation2 + $0x30] sm:$0xff] (!%p291_p9), %vm368_vm1, %v2467_v6  ;;  %458 = vst.msk [vmem:[#allocation2] sm:$0xff] (!%p291_p9), %vm368_vm1, %v2467_v6  ;;  %s2469_s16 = smov (!%p291_p9), 8   ;;  %v2395_v46 = vld [vmem:[%s3200_s3] sm:$0xff] (!%p291_p9)   ;;  %s2470_s22 = smov (!%p291_p9), 24   ;;  %v2396_v51 = vld [vmem:[%s3200_s3 + $0x8] sm:$0xff] (!%p291_p9)  }
  0x10   : > { %466 = vst.msk [vmem:[#allocation2 + $0x38] sm:$0x3] (!%p291_p9), %vm459_vm2, %v2467_v6  ;;  %460 = vst.msk [vmem:[#allocation2 + $0x8] sm:$0x3] (!%p291_p9), %vm459_vm2, %v2467_v6  ;;  %1950 = vmatprep.subr.bf16.mxu1 (!%p291_p9), %v2395_v46  ;;  %v2397_v56 = vld [vmem:[%s3200_s3 + $0x10] sm:$0xff] (!%p291_p9)   ;;  %s2472_s28 = smov (!%p291_p9), 40  }
  0x11   : > { %461 = vst.msk [vmem:[#allocation2 + $0x10] sm:$0xff] (!%p291_p9), %vm368_vm1, %v2467_v6  ;;  %463 = vst.msk [vmem:[#allocation2 + $0x20] sm:$0xff] (!%p291_p9), %vm368_vm1, %v2467_v6  ;;  %v2398_v60 = vld [vmem:[%s3200_s3 + $0x18] sm:$0xff] (!%p291_p9)   ;;  %v2399_v0 = vld [vmem:[%s3200_s3 + $0x20] ss:$0 sps:$4 sm:$0xff] (!%p291_p9)   ;;  %s2473_s25 = smov (!%p291_p9), 48  }
  0x12   : > { %462 = vst.msk [vmem:[#allocation2 + $0x18] sm:$0x3] (!%p291_p9), %vm459_vm2, %v2467_v6  ;;  %464 = vst.msk [vmem:[#allocation2 + $0x28] sm:$0x3] (!%p291_p9), %vm459_vm2, %v2467_v6  ;;  %v949_v1 = vsel (!%p291_p9), %vm381_vm0, %v2399_v0, 0  ;;  %s2474_s26 = smov (!%p291_p9), 56  }
  0x13   : > { %467 = vst.msk [vmem:[#allocation2 + $0x40] sm:$0xff] (!%p291_p9), %vm368_vm1, %v2467_v6  ;;  %469 = vst.msk [vmem:[#allocation2 + $0x50] sm:$0xff] (!%p291_p9), %vm368_vm1, %v2467_v6  ;;  %vm825_vm3 = vcmask (!%p291_p9), 130048   ;;  %vm834_vm4 = vcmask (!%p291_p9), 195584   ;;  %vm843_vm5 = vcmask (!%p291_p9), 261120   ;;  %vm852_vm6 = vcmask (!%p291_p9), 326656  }
  0x14   : > { %468 = vst.msk [vmem:[#allocation2 + $0x48] sm:$0x3] (!%p291_p9), %vm459_vm2, %v2467_v6  ;;  %470 = vst.msk [vmem:[#allocation2 + $0x58] sm:$0x3] (!%p291_p9), %vm459_vm2, %v2467_v6  ;;  %vm861_vm7 = vcmask (!%p291_p9), 392192   ;;  %vm870_vm8 = vcmask (!%p291_p9), 457728  }
  0x15   : > { %s327_s23 = scalar_select %p326_p10, %s2555_s13, 1  ;;  %471 = vst.msk [vmem:[#allocation2 + $0x60] sm:$0xff] %vm368_vm1, %v2467_v6  ;;  %473 = vst.msk [vmem:[#allocation2 + $0x70] sm:$0xff] %vm368_vm1, %v2467_v6  ;;  %vm879_vm9 = vcmask 523264   ;;  %vm935_vm10 = vcmask 588800   ;;  %vm1024_vm11 = vcmask 31744  }
  0x16   : > { %472 = vst.msk [vmem:[#allocation2 + $0x68] sm:$0x3] %vm459_vm2, %v2467_v6  ;;  %474 = vst.msk [vmem:[#allocation2 + $0x78] sm:$0x3] %vm459_vm2, %v2467_v6  ;;  %vm1026_vm12 = vcmask 25600   ;;  %s2476_s17 = smov 124  }
  0x17   : > { %s1912_s24 = sshll.u32 %s327_s23, 5  ;;  %475 = vst.msk [vmem:[#allocation2 + $0x80] sm:$0xff] %vm368_vm1, %v2467_v6  ;;  %477 = vst.msk [vmem:[#allocation2 + $0x90] sm:$0xff] %vm368_vm1, %v2467_v6  ;;  %v504_v26 = vld [vmem:[#allocation2 + $0x2] sm:$0xff]  ;;  %s2471_s23 = smov 32   ;;  %vm1527_vm13 = vcmask 1041408  }
  0x18   : > { %s330_s27 = scalar_lea.vmem %s3197_s0, %s1912_s24  ;;  %476 = vst.msk [vmem:[#allocation2 + $0x88] sm:$0x3] %vm459_vm2, %v2467_v6  ;;  %478 = vst.msk [vmem:[#allocation2 + $0x98] sm:$0x3] %vm459_vm2, %v2467_v6  ;;  %v496_v27 = vld [vmem:[#allocation2 + $0x1] sm:$0xff]  ;;  %s2477_s21 = smov 4  }
  0x19   : > { %v2391_v2 = vld [vmem:[%s330_s27] sm:$0xff]   ;;  %v2392_v3 = vld [vmem:[%s330_s27 + $0x8] sm:$0xff]   ;;  %v2393_v4 = vld [vmem:[%s330_s27 + $0x10] sm:$0xff]   ;;  %1028 = vst.msk [vmem:[#allocation3 + $0x10] sm:$0xff] %vm1024_vm11, %v2467_v6  ;;  %s2478_s24 = smov 12   ;;  %vm1432_vm14 = vcmask 97280  }
  0x1a   : > { %1942 = vmatprep.mubr.msk.bf16.mxu1 %vm368_vm1, %v2391_v2  ;;  %v2394_v5 = vld [vmem:[%s330_s27 + $0x18] sm:$0xff]   ;;  %s2475_s27 = smov 64   ;;  %1029 = vst.msk [vmem:[#allocation3 + $0x18] sm:$0x3] %vm1026_vm12, %v2467_v6  ;;  %1027 = vst.msk [vmem:[#allocation3 + $0x8] sm:$0x3] %vm1026_vm12, %v2467_v6 }
  0x1b   : > { %1943 = vmatmul.mubr.msk.bf16.vlgmr.msra.gmra.mrb[0].mxu1 %vm368_vm1, %v2392_v3  ;;  %1025 = vst.msk [vmem:[#allocation3] sm:$0xff] %vm1024_vm11, %v2467_v6  ;;  %1030 = vst.msk [vmem:[#allocation3 + $0x20] sm:$0xff] %vm1024_vm11, %v2467_v6  ;;  %vm1449_vm15 = vcmask 162816   ;;  %vm1466_vm2 = vcmask 228352  }
  0x1c   : > { %1946 = vmatprep.mubr.msk.bf16.mxu1 %vm368_vm1, %v2393_v4  ;;  %1951 = vmatpush3.bf16.msra.mxu1 %v2395_v46  ;;  %1031 = vst.msk [vmem:[#allocation3 + $0x28] sm:$0x3] %vm1026_vm12, %v2467_v6  ;;  %1033 = vst.msk [vmem:[#allocation3 + $0x38] sm:$0x3] %vm1026_vm12, %v2467_v6 }
  0x1d   : > { %1952 = vmatprep.subr.bf16.mxu1 %v2396_v51  ;;  %1032 = vst.msk [vmem:[#allocation3 + $0x30] sm:$0xff] %vm1024_vm11, %v2467_v6  ;;  %1034 = vst.msk [vmem:[#allocation3 + $0x40] sm:$0xff] %vm1024_vm11, %v2467_v6 }
  0x1e   : > { %1035 = vst.msk [vmem:[#allocation3 + $0x48] sm:$0x3] %vm1026_vm12, %v2467_v6  ;;  %1037 = vst.msk [vmem:[#allocation3 + $0x58] sm:$0x3] %vm1026_vm12, %v2467_v6 }
  0x1f   : > { %1036 = vst.msk [vmem:[#allocation3 + $0x50] sm:$0xff] %vm1024_vm11, %v2467_v6  ;;  %1038 = vst.msk [vmem:[#allocation3 + $0x60] sm:$0xff] %vm1024_vm11, %v2467_v6 }
  0x20   : > { %1953 = vmatpush3.bf16.msra.mxu1 %v2396_v51  ;;  %1039 = vst.msk [vmem:[#allocation3 + $0x68] sm:$0x3] %vm1026_vm12, %v2467_v6  ;;  %1041 = vst.msk [vmem:[#allocation3 + $0x78] sm:$0x3] %vm1026_vm12, %v2467_v6 }
  0x21   : > { %1954 = vmatprep.subr.bf16.mxu1 %v2397_v56  ;;  %1040 = vst.msk [vmem:[#allocation3 + $0x70] sm:$0xff] %vm1024_vm11, %v2467_v6  ;;  %1042 = vst.msk [vmem:[#allocation3 + $0x80] sm:$0xff] %vm1024_vm11, %v2467_v6 }
  0x22   : > { %1043 = vst.msk [vmem:[#allocation3 + $0x88] sm:$0x3] %vm1026_vm12, %v2467_v6  ;;  %1045 = vst.msk [vmem:[#allocation3 + $0x98] sm:$0x3] %vm1026_vm12, %v2467_v6 }
  0x23   : > { %1947 = vmatmul.mubr.msk.bf16.gmra.mrb[4].mxu1 %vm368_vm1, %v2394_v5  ;;  %1044 = vst.msk [vmem:[#allocation3 + $0x90] sm:$0xff] %vm1024_vm11, %v2467_v6 }
  0x24   : > { %1955 = vmatpush3.bf16.msra.mxu1 %v2397_v56 }
  0x25   : > { %1956 = vmatprep.subr.bf16.mxu1 %v2398_v60 }
  0x28   : > { %1957 = vmatpush3.bf16.msra.mxu1 %v2398_v60 }
  0x29   : > { %1993 = vmatprep.subr.msk.bf16.mxu1 %vm381_vm0, %v2399_v0 }
  0x2c   : > { %1959 = vmatpush3.bf16.msra.mxu1 %v949_v1 }
  0xee   : > { %v1944_v8 = vpop.f32.mrb[0].mxu1 }
  0xef   : > { %v2639_v9 = vadd.f32 %v1944_v8, %v1875_v7  ;;  %v419_v10 = vpop.f32.mrb[1].mxu1 }
  0xf0   : > { %v2641_v11 = vadd.f32 %v1875_v7, %v419_v10  ;;  %v1945_v12 = vpop.f32.mrb[2].mxu1 }
  0xf1   : > { %v452_v13 = vmax.f32 %v2639_v9, 0.0  ;;  %v2644_v14 = vadd.f32 %v1945_v12, %v1875_v7  ;;  %v422_v15 = vpop.f32.mrb[3].mxu1 }
  0xf2   : > { %v450_v16 = vmax.f32 %v2641_v11, 0.0  ;;  %v2647_v17 = vadd.f32 %v1875_v7, %v422_v15 }
  0xf3   : > { %482 = vst.msk [vmem:[#allocation2 + $0x31] sm:$0xff] %vm368_vm1, %v452_v13  ;;  %v453_v18 = vmax.f32 %v2644_v14, 0.0 }
  0xf4   : > { %480 = vst.msk [vmem:[#allocation2 + $0x11] sm:$0xff] %vm368_vm1, %v450_v16  ;;  %v451_v19 = vmax.f32 %v2647_v17, 0.0 }
  0xf5   : > { %483 = vst.msk [vmem:[#allocation2 + $0x41] sm:$0xff] %vm368_vm1, %v453_v18 }
  0xf6   : > { %481 = vst.msk [vmem:[#allocation2 + $0x21] sm:$0xff] %vm368_vm1, %v451_v19  ;;  %v1948_v20 = vpop.f32.mrb[4].mxu1 }
  0xf7   : > { %v2655_v21 = vadd.f32 %v1948_v20, %v1875_v7  ;;  %v435_v22 = vpop.f32.mrb[5].mxu1 }
  0xf8   : > { %v2657_v23 = vadd.f32 %v1875_v7, %v435_v22  ;;  %v1949_v24 = vpop.f32.mrb[6].mxu1  ;;  %v544_v22 = vld [vmem:[#allocation2 + $0x90] sm:$0xff] }
  0xf9   : > { %v456_v25 = vmax.f32 %v2655_v21, 0.0  ;;  %v2660_v28 = vadd.f32 %v1949_v24, %v1875_v7  ;;  %v438_v29 = vpop.f32.mrb[7].mxu1 }
  0xfa   : > { %v454_v30 = vmax.f32 %v2657_v23, 0.0  ;;  %v2663_v31 = vadd.f32 %v1875_v7, %v438_v29  ;;  %v2675_v40 = vld [vmem:[#allocation2 + $0x30] sm:$0xff] }
  0xfb   : > { %486 = vst.msk [vmem:[#allocation2 + $0x71] sm:$0xff] %vm368_vm1, %v456_v25  ;;  %v505_v32 = vld [vmem:[#allocation2 + $0x12] sm:$0xff]  ;;  %v457_v34 = vmax.f32 %v2660_v28, 0.0 }
  0xfc   : > { %v497_v33 = vld [vmem:[#allocation2 + $0x11] sm:$0xff]  ;;  %484 = vst.msk [vmem:[#allocation2 + $0x51] sm:$0xff] %vm368_vm1, %v454_v30  ;;  %v2056_v35 = vpack.i.bf16 %v505_v32, %v504_v26  ;;  %v455_v37 = vmax.f32 %v2663_v31, 0.0  ;;  %v2670_v38 = vld [vmem:[#allocation2 + $0x40] sm:$0xff] }
  0xfd   : > { %v2051_v36 = vpack.i.bf16 %v497_v33, %v496_v27  ;;  %487 = vst.msk [vmem:[#allocation2 + $0x81] sm:$0xff] %vm368_vm1, %v457_v34  ;;  %v498_v39 = vld [vmem:[#allocation2 + $0x21] sm:$0xff]  ;;  %v499_v41 = vld [vmem:[#allocation2 + $0x31] sm:$0xff]  ;;  %v2061_v42 = vpack.i.bf16 %v2670_v38, %v2675_v40 }
  0xfe   : > { %2057 = vrot.lane.b32.xlu1 %v2056_v35, %s2468_s14  ;;  %485 = vst.msk [vmem:[#allocation2 + $0x61] sm:$0xff] %vm368_vm1, %v455_v37  ;;  %v2076_v43 = vpack.i.bf16 %v499_v41, %v498_v39  ;;  %v523_v44 = vld [vmem:[#allocation2 + $0x41] sm:$0xff]  ;;  %v2686_v47 = vld [vmem:[#allocation2 + $0x10] sm:$0xff]  ;;  %v2091_v54 = vpack.i.bf16 %v498_v39, %v497_v33 }
  0xff   : > { %2052 = vrot.lane.b32.xlu0 %v2051_v36, %s2469_s16  ;;  %v2679_v45 = vld [vmem:[#allocation2 + $0x20] sm:$0xff]  ;;  %v2066_v48 = vpack.i.bf16 %v523_v44, %v499_v41  ;;  %v530_v52 = vld [vmem:[#allocation2 + $0x32] sm:$0xff] }
 0x100   : > { %v2086_v49 = vpack.i.bf16 %v2679_v45, %v2686_v47  ;;  %v531_v50 = vld [vmem:[#allocation2 + $0x42] sm:$0xff]  ;;  %v2101_v62 = vpack.i.bf16 %v2675_v40, %v2679_v45  ;;  %v552_v34 = vld [vmem:[#allocation2 + $0x91] sm:$0xff] }
 0x101   : > { %v2071_v53 = vpack.i.bf16 %v531_v50, %v530_v52  ;;  %v506_v55 = vld [vmem:[#allocation2 + $0x22] sm:$0xff]  ;;  %v560_v36 = vld [vmem:[#allocation2 + $0x92] sm:$0xff] }
 0x102   : > { %2062 = vrot.lane.b32.xlu1 %v2061_v42, %s2470_s22  ;;  %v2081_v57 = vpack.i.bf16 %v530_v52, %v506_v55  ;;  %v2096_v58 = vpack.i.bf16 %v506_v55, %v505_v32  ;;  %v2720_v3 = vld [vmem:[#allocation2 + $0x70] sm:$0xff] }
 0x103   : > { %2077 = vrot.lane.b32.xlu0 %v2076_v43, %s2469_s16  ;;  %v2700_v59 = vld [vmem:[#allocation2 + $0x50] sm:$0xff] }
 0x104   : > { %v2116_v61 = vpack.i.bf16 %v2700_v59, %v2670_v38  ;;  %v548_v63 = vld [vmem:[#allocation2 + $0x51] sm:$0xff]  ;;  %v519_v4 = vld [vmem:[#allocation2 + $0x80] sm:$0xff] }
 0x105   : > { %v2121_v2 = vpack.i.bf16 %v548_v63, %v523_v44  ;;  %v556_v5 = vld [vmem:[#allocation2 + $0x52] sm:$0xff]  ;;  %v2141_v7 = vpack.i.bf16 %v519_v4, %v2720_v3  ;;  %v527_v12 = vld [vmem:[#allocation2 + $0x81] sm:$0xff]  ;;  %v2156_v25 = vpack.i.bf16 %v544_v22, %v519_v4 }
 0x106   : > { %2067 = vrot.lane.b32.xlu1 %v2066_v48, %s2471_s23  ;;  %v2131_v8 = vpack.i.bf16 %v556_v5, %v531_v50  ;;  %v526_v10 = vld [vmem:[#allocation2 + $0x71] sm:$0xff]  ;;  %v535_v16 = vld [vmem:[#allocation2 + $0x82] sm:$0xff]  ;;  %v2171_v35 = vpack.i.bf16 %v552_v34, %v527_v12 }
 0x107   : > { %2087 = vrot.lane.b32.xlu0 %v2086_v49, %s2470_s22  ;;  %v2146_v13 = vpack.i.bf16 %v527_v12, %v526_v10  ;;  %v534_v15 = vld [vmem:[#allocation2 + $0x72] sm:$0xff]  ;;  %v2727_v18 = vld [vmem:[#allocation2 + $0x60] sm:$0xff]  ;;  %v2206_v37 = vpack.i.bf16 %v560_v36, %v535_v16 }
 0x108   : > { %v2151_v19 = vpack.i.bf16 %v535_v16, %v534_v15  ;;  %v2176_v20 = vpack.i.bf16 %v2727_v18, %v2700_v59  ;;  %v525_v24 = vld [vmem:[#allocation2 + $0x61] sm:$0xff]  ;;  %v2191_v33 = vpack.i.bf16 %v2720_v3, %v2727_v18 }
 0x109   : > { %v2181_v26 = vpack.i.bf16 %v525_v24, %v548_v63  ;;  %v533_v27 = vld [vmem:[#allocation2 + $0x62] sm:$0xff]  ;;  %v2161_v29 = vpack.i.bf16 %v526_v10, %v525_v24 }
 0x10a   : > { %2072 = vrot.lane.b32.xlu1 %v2071_v53, %s2472_s28  ;;  %v2186_v30 = vpack.i.bf16 %v533_v27, %v556_v5  ;;  %v2166_v32 = vpack.i.bf16 %v534_v15, %v533_v27 }
 0x10b   : > { %2092 = vrot.lane.b32.xlu0 %v2091_v54, %s2471_s23  ;;  %v488_v54 = vld [vmem:[#allocation2] sm:$0xff] }
 0x10e   : > { %2082 = vrot.lane.b32.xlu1 %v2081_v57, %s2468_s14 }
 0x10f   : > { %2097 = vrot.lane.b32.xlu0 %v2096_v58, %s2472_s28 }
 0x112   : > { %2117 = vrot.lane.b32.xlu1 %v2116_v61, %s2473_s25 }
 0x113   : > { %2102 = vrot.lane.b32.xlu0 %v2101_v62, %s2473_s25 }
 0x116   : > { %2122 = vrot.lane.b32.xlu1 %v2121_v2, %s2474_s26 }
 0x117   : > { %2107 = vrot.lane.b32.xlu0 %v2076_v43, %s2474_s26 }
 0x11a   : > { %2127 = vrot.lane.b32.xlu1 %v2121_v2, %s2469_s16 }
 0x11b   : > { %2112 = vrot.lane.b32.xlu0 %v2081_v57, %s2475_s27 }
 0x11e   : > { %2142 = vrot.lane.b32.xlu1 %v2141_v7, %s2470_s22 }
 0x11f   : > { %2132 = vrot.lane.b32.xlu0 %v2131_v8, %s2475_s27 }
 0x122   : > { %2147 = vrot.lane.b32.xlu1 %v2146_v13, %s2471_s23 }
 0x123   : > { %2137 = vrot.lane.b32.xlu0 %v2131_v8, %s2468_s14 }
 0x126   : > { %2152 = vrot.lane.b32.xlu1 %v2151_v19, %s2472_s28 }
 0x127   : > { %2177 = vrot.lane.b32.xlu0 %v2176_v20, %s2470_s22 }
 0x12a   : > { %2157 = vrot.lane.b32.xlu1 %v2156_v25, %s2473_s25 }
 0x12b   : > { %2182 = vrot.lane.b32.xlu0 %v2181_v26, %s2471_s23 }
 0x12e   : > { %2162 = vrot.lane.b32.xlu1 %v2161_v29, %s2469_s16 }
 0x12f   : > { %2187 = vrot.lane.b32.xlu0 %v2186_v30, %s2472_s28  ;;  %s2482_s28 = smov [#allocation4]  }
 0x130   : > { %s2407_s29 = sshll.u32 %s2482_s28, 4  ;;  %s2408_s29 = int_to_ptr.vmem [resolvable:$false] %s2407_s29 }
 0x132   : > { %2167 = vrot.lane.b32.xlu1 %v2166_v32, %s2468_s14 }
 0x133   : > { %2192 = vrot.lane.b32.xlu0 %v2191_v33, %s2473_s25 }
 0x136   : > { %2172 = vrot.lane.b32.xlu1 %v2171_v35, %s2474_s26 }
 0x137   : > { %2197 = vrot.lane.b32.xlu0 %v2161_v29, %s2474_s26  ;;  %s2480_s26 = smov 28  }
 0x13a   : > { %2207 = vrot.lane.b32.xlu1 %v2206_v37, %s2475_s27 }
 0x13b   : > { %2202 = vrot.lane.b32.xlu0 %v2166_v32, %s2475_s27  ;;  %s2479_s27 = smov 20  }
 0x170   : > { %v2058_v39 = vpop.permute.xlu1 %2057 }
 0x171   : > { %v2053_v41 = vpop.permute.xlu0 %2052  ;;  %v2060_v57 = vunpack.i.h.bf16 %v2058_v39  ;;  %v2059_v58 = vunpack.i.l.bf16 %v2058_v39 }
 0x172   : > { %v2055_v50 = vunpack.i.h.bf16 %v2053_v41  ;;  %v2054_v51 = vunpack.i.l.bf16 %v2053_v41 }
 0x174   : > { %v2063_v42 = vpop.permute.xlu1 %2062  ;;  %v817_v62 = vsel %vm368_vm1, %v488_v54, %v2054_v51  ;;  %v818_v63 = vsel %vm368_vm1, %v2686_v47, %v2055_v50 }
 0x175   : > { %v2078_v43 = vpop.permute.xlu0 %2077  ;;  %v2065_v5 = vunpack.i.h.bf16 %v2063_v42  ;;  %v2064_v7 = vunpack.i.l.bf16 %v2063_v42  ;;  %v826_v47 = vsel %vm825_vm3, %v817_v62, %v2059_v58  ;;  %v827_v15 = vsel %vm825_vm3, %v818_v63, %v2060_v57 }
 0x176   : > { %v2080_v52 = vunpack.i.h.bf16 %v2078_v43  ;;  %v2079_v53 = vunpack.i.l.bf16 %v2078_v43 }
 0x178   : > { %v2068_v44 = vpop.permute.xlu1 %2067  ;;  %v820_v0 = vsel %vm368_vm1, %v2675_v40, %v2080_v52  ;;  %v819_v1 = vsel %vm368_vm1, %v2679_v45, %v2079_v53 }
 0x179   : > { %v2088_v46 = vpop.permute.xlu0 %2087  ;;  %v2070_v20 = vunpack.i.h.bf16 %v2068_v44  ;;  %v2069_v22 = vunpack.i.l.bf16 %v2068_v44 }
 0x17a   : > { %v2090_v8 = vunpack.i.h.bf16 %v2088_v46  ;;  %v2089_v10 = vunpack.i.l.bf16 %v2088_v46 }
 0x17c   : > { %v2747_v48 = vpop.permute.xlu1 %2072  ;;  %v835_v26 = vsel %vm834_vm4, %v826_v47, %v2089_v10  ;;  %v836_v27 = vsel %vm834_vm4, %v827_v15, %v2090_v8 }
 0x17d   : > { %v2093_v49 = vpop.permute.xlu0 %2092  ;;  %v2075_v29 = vunpack.i.h.bf16 %v2747_v48  ;;  %v2074_v30 = vunpack.i.l.bf16 %v2747_v48 }
 0x17e   : > { %v2095_v40 = vunpack.i.h.bf16 %v2093_v49  ;;  %v2094_v45 = vunpack.i.l.bf16 %v2093_v49 }
 0x180   : > { %v2083_v55 = vpop.permute.xlu1 %2082  ;;  %v844_v39 = vsel %vm843_vm5, %v835_v26, %v2094_v45  ;;  %v845_v41 = vsel %vm843_vm5, %v836_v27, %v2095_v40 }
 0x181   : > { %v2098_v56 = vpop.permute.xlu0 %2097  ;;  %v2085_v60 = vunpack.i.h.bf16 %v2083_v55  ;;  %v2084_v61 = vunpack.i.l.bf16 %v2083_v55 }
 0x182   : > { %v2100_v24 = vunpack.i.h.bf16 %v2098_v56  ;;  %v2099_v25 = vunpack.i.l.bf16 %v2098_v56 }
 0x183   : > { %v828_v2 = vsel %vm825_vm3, %v819_v1, %v2084_v61  ;;  %v829_v4 = vsel %vm825_vm3, %v820_v0, %v2085_v60 }
 0x184   : > { %v2118_v12 = vpop.permute.xlu1 %2117  ;;  %v837_v16 = vsel %vm834_vm4, %v828_v2, %v2064_v7  ;;  %v838_v19 = vsel %vm834_vm4, %v829_v4, %v2065_v5  ;;  %v853_v44 = vsel %vm852_vm6, %v844_v39, %v2099_v25  ;;  %v854_v46 = vsel %vm852_vm6, %v845_v41, %v2100_v24 }
 0x185   : > { %v2103_v13 = vpop.permute.xlu0 %2102  ;;  %v846_v34 = vsel %vm843_vm5, %v837_v16, %v2069_v22  ;;  %v847_v35 = vsel %vm843_vm5, %v838_v19, %v2070_v20  ;;  %v2120_v48 = vunpack.i.h.bf16 %v2118_v12  ;;  %v2119_v49 = vunpack.i.l.bf16 %v2118_v12 }
 0x186   : > { %v2105_v36 = vunpack.i.h.bf16 %v2103_v13  ;;  %v2104_v37 = vunpack.i.l.bf16 %v2103_v13  ;;  %v855_v50 = vsel %vm852_vm6, %v846_v34, %v2074_v30  ;;  %v856_v51 = vsel %vm852_vm6, %v847_v35, %v2075_v29 }
 0x187   : > { %v864_v5 = vsel %vm861_vm7, %v855_v50, %v2119_v49  ;;  %v865_v7 = vsel %vm861_vm7, %v856_v51, %v2120_v48 }
 0x188   : > { %v2123_v32 = vpop.permute.xlu1 %2122  ;;  %v862_v54 = vsel %vm861_vm7, %v853_v44, %v2104_v37  ;;  %v863_v55 = vsel %vm861_vm7, %v854_v46, %v2105_v36 }
 0x189   : > { %v2108_v33 = vpop.permute.xlu0 %2107  ;;  %v2125_v58 = vunpack.i.h.bf16 %v2123_v32  ;;  %v2124_v60 = vunpack.i.l.bf16 %v2123_v32 }
 0x18a   : > { %v2110_v42 = vunpack.i.h.bf16 %v2108_v33  ;;  %v2109_v43 = vunpack.i.l.bf16 %v2108_v33 }
 0x18b   : > { %v873_v12 = vsel %vm870_vm8, %v864_v5, %v2124_v60  ;;  %v874_v13 = vsel %vm870_vm8, %v865_v7, %v2125_v58 }
 0x18c   : > { %v2128_v52 = vpop.permute.xlu1 %2127  ;;  %v871_v61 = vsel %vm870_vm8, %v862_v54, %v2109_v43  ;;  %v872_v62 = vsel %vm870_vm8, %v863_v55, %v2110_v42 }
 0x18d   : > { %v2113_v53 = vpop.permute.xlu0 %2112  ;;  %v2130_v25 = vunpack.i.h.bf16 %v2128_v52  ;;  %v2129_v26 = vunpack.i.l.bf16 %v2128_v52 }
 0x18e   : > { %v2115_v56 = vunpack.i.h.bf16 %v2113_v53  ;;  %v2114_v57 = vunpack.i.l.bf16 %v2113_v53 }
 0x18f   : > { %v822_v35 = vsel %vm368_vm1, %v2700_v59, %v2130_v25  ;;  %v821_v36 = vsel %vm368_vm1, %v2670_v38, %v2129_v26 }
 0x190   : > { %v880_v63 = vsel %vm879_vm9, %v871_v61, %v2114_v57  ;;  %v881_v0 = vsel %vm879_vm9, %v872_v62, %v2115_v56  ;;  %v2143_v2 = vpop.permute.xlu1 %2142 }
 0x191   : > { %v888_v1 = vpack.c.bf16 %v881_v0, %v880_v63  ;;  %v2133_v4 = vpop.permute.xlu0 %2132  ;;  %v2145_v37 = vunpack.i.h.bf16 %v2143_v2  ;;  %v2144_v39 = vunpack.i.l.bf16 %v2143_v2 }
 0x192   : > { %v2135_v8 = vunpack.i.h.bf16 %v2133_v4  ;;  %v2134_v10 = vunpack.i.l.bf16 %v2133_v4 }
 0x193   : > { %1960 = vmatprep.mubr.msk.bf16.mxu1 %vm935_vm10, %v888_v1 }
 0x194   : > { %v882_v47 = vsel %vm879_vm9, %v873_v12, %v2134_v10  ;;  %v883_v15 = vsel %vm879_vm9, %v874_v13, %v2135_v8  ;;  %v2148_v45 = vpop.permute.xlu1 %2147 }
 0x195   : > { %v889_v40 = vpack.c.bf16 %v883_v15, %v882_v47  ;;  %v2138_v16 = vpop.permute.xlu0 %2137  ;;  %v2150_v46 = vunpack.i.h.bf16 %v2148_v45  ;;  %v2149_v48 = vunpack.i.l.bf16 %v2148_v45 }
 0x196   : > { %v2140_v27 = vunpack.i.h.bf16 %v2138_v16  ;;  %v2139_v29 = vunpack.i.l.bf16 %v2138_v16 }
 0x197   : > { %1961 = vmatmul.mubr.msk.bf16.vlgmr.msra.gmra.mrb[8].mxu1 %vm935_vm10, %v889_v40 }
 0x198   : > { %v2153_v19 = vpop.permute.xlu1 %2152  ;;  %v831_v49 = vsel %vm825_vm3, %v822_v35, %v2140_v27  ;;  %v830_v50 = vsel %vm825_vm3, %v821_v36, %v2139_v29 }
 0x199   : > { %v2178_v20 = vpop.permute.xlu0 %2177  ;;  %v2155_v51 = vunpack.i.h.bf16 %v2153_v19  ;;  %v2154_v52 = vunpack.i.l.bf16 %v2153_v19 }
 0x19a   : > { %v2180_v30 = vunpack.i.h.bf16 %v2178_v20  ;;  %v2179_v32 = vunpack.i.l.bf16 %v2178_v20 }
 0x19c   : > { %v2158_v22 = vpop.permute.xlu1 %2157  ;;  %v839_v53 = vsel %vm834_vm4, %v830_v50, %v2179_v32  ;;  %v840_v59 = vsel %vm834_vm4, %v831_v49, %v2180_v30  ;;  %v1884_v50 = vld [vmem:[%s3201_s4] ss:$0 sm:$0xff] }
 0x19d   : > { %v2183_v24 = vpop.permute.xlu0 %2182  ;;  %v2160_v55 = vunpack.i.h.bf16 %v2158_v22  ;;  %v2159_v56 = vunpack.i.l.bf16 %v2158_v22 }
 0x19e   : > { %v2185_v41 = vunpack.i.h.bf16 %v2183_v24  ;;  %v2184_v42 = vunpack.i.l.bf16 %v2183_v24 }
 0x1a0   : > { %v2163_v33 = vpop.permute.xlu1 %2162  ;;  %v848_v60 = vsel %vm843_vm5, %v839_v53, %v2184_v42  ;;  %v849_v61 = vsel %vm843_vm5, %v840_v59, %v2185_v41 }
 0x1a1   : > { %v2188_v34 = vpop.permute.xlu0 %2187  ;;  %v2165_v43 = vunpack.i.h.bf16 %v2163_v33  ;;  %v2164_v44 = vunpack.i.l.bf16 %v2163_v33 }
 0x1a2   : > { %v2190_v0 = vunpack.i.h.bf16 %v2188_v34  ;;  %v2189_v1 = vunpack.i.l.bf16 %v2188_v34 }
 0x1a3   : > { %v824_v62 = vsel %vm368_vm1, %v2720_v3, %v2165_v43  ;;  %v823_v63 = vsel %vm368_vm1, %v2727_v18, %v2164_v44 }
 0x1a4   : > { %v2168_v54 = vpop.permute.xlu1 %2167  ;;  %v857_v20 = vsel %vm852_vm6, %v848_v60, %v2189_v1  ;;  %v858_v22 = vsel %vm852_vm6, %v849_v61, %v2190_v0 }
 0x1a5   : > { %v2193_v38 = vpop.permute.xlu0 %2192  ;;  %v2170_v57 = vunpack.i.h.bf16 %v2168_v54  ;;  %v2169_v58 = vunpack.i.l.bf16 %v2168_v54 }
 0x1a6   : > { %v2195_v8 = vunpack.i.h.bf16 %v2193_v38  ;;  %v2194_v10 = vunpack.i.l.bf16 %v2193_v38 }
 0x1a7   : > { %v832_v2 = vsel %vm825_vm3, %v823_v63, %v2169_v58  ;;  %v833_v4 = vsel %vm825_vm3, %v824_v62, %v2170_v57 }
 0x1a8   : > { %v841_v5 = vsel %vm834_vm4, %v832_v2, %v2144_v39  ;;  %v842_v7 = vsel %vm834_vm4, %v833_v4, %v2145_v37  ;;  %v2173_v12 = vpop.permute.xlu1 %2172  ;;  %v866_v26 = vsel %vm861_vm7, %v857_v20, %v2194_v10  ;;  %v867_v27 = vsel %vm861_vm7, %v858_v22, %v2195_v8 }
 0x1a9   : > { %v2198_v13 = vpop.permute.xlu0 %2197  ;;  %v850_v47 = vsel %vm843_vm5, %v841_v5, %v2149_v48  ;;  %v851_v3 = vsel %vm843_vm5, %v842_v7, %v2150_v46  ;;  %v2175_v15 = vunpack.i.h.bf16 %v2173_v12  ;;  %v2174_v18 = vunpack.i.l.bf16 %v2173_v12 }
 0x1aa   : > { %v859_v40 = vsel %vm852_vm6, %v850_v47, %v2154_v52  ;;  %v860_v45 = vsel %vm852_vm6, %v851_v3, %v2155_v51  ;;  %v2200_v16 = vunpack.i.h.bf16 %v2198_v13  ;;  %v2199_v19 = vunpack.i.l.bf16 %v2198_v13 }
 0x1ab   : > { %v868_v24 = vsel %vm861_vm7, %v859_v40, %v2159_v56  ;;  %v869_v25 = vsel %vm861_vm7, %v860_v45, %v2160_v55  ;;  %vm1514_vm6 = vcmask 293888  }
 0x1ac   : > { %v2208_v29 = vpop.permute.xlu1 %2207  ;;  %v877_v36 = vsel %vm870_vm8, %v868_v24, %v2174_v18  ;;  %v878_v37 = vsel %vm870_vm8, %v869_v25, %v2175_v15  ;;  %v875_v39 = vsel %vm870_vm8, %v866_v26, %v2199_v19  ;;  %v876_v41 = vsel %vm870_vm8, %v867_v27, %v2200_v16  ;;  %v1095_v18 = vld [vmem:[#allocation3 + $0x1] sm:$0xff] }
 0x1ad   : > { %v2203_v30 = vpop.permute.xlu0 %2202  ;;  %v2210_v32 = vunpack.i.h.bf16 %v2208_v29  ;;  %v2209_v33 = vunpack.i.l.bf16 %v2208_v29  ;;  %v1103_v16 = vld [vmem:[#allocation3 + $0x2] sm:$0xff] }
 0x1ae   : > { %v2205_v34 = vunpack.i.h.bf16 %v2203_v30  ;;  %v2204_v35 = vunpack.i.l.bf16 %v2203_v30 }
 0x1af   : > { %v886_v42 = vsel %vm879_vm9, %v877_v36, %v2209_v33  ;;  %v887_v43 = vsel %vm879_vm9, %v878_v37, %v2210_v32 }
 0x1b0   : > { %v884_v44 = vsel %vm879_vm9, %v875_v39, %v2204_v35  ;;  %v885_v46 = vsel %vm879_vm9, %v876_v41, %v2205_v34  ;;  %v891_v48 = vpack.c.bf16 %v887_v43, %v886_v42  ;;  %v2400_v42 = vld [vmem:[%s3202_s5] sm:$0xff]  }
 0x1b1   : > { %v890_v49 = vpack.c.bf16 %v885_v46, %v884_v44  ;;  %1968 = vmatprep.subr.bf16.mxu0 %v2400_v42  ;;  %v2401_v46 = vld [vmem:[%s3202_s5 + $0x8] sm:$0xff]  }
 0x1b2   : > { %1969 = vmatpush3.bf16.msra.mxu0 %v2400_v42 }
 0x1b3   : > { %1964 = vmatprep.mubr.msk.bf16.mxu1 %vm935_vm10, %v890_v49  ;;  %1970 = vmatprep.subr.bf16.mxu0 %v2401_v46 }
 0x1b4   : > { %1965 = vmatmul.mubr.msk.bf16.gmra.mrb[12].mxu1 %vm935_vm10, %v891_v48 }
 0x1b6   : > { %1971 = vmatpush3.bf16.msra.mxu0 %v2401_v46 }
 0x26a   : > { %v1962_v51 = vpop.f32.mrb[8].mxu1 }
 0x26b   : > { %v985_v52 = vpop.f32.mrb[9].mxu1  ;;  %v2871_v38 = vadd.f32 %v1962_v51, %v1884_v50 }
 0x26c   : > { %v2869_v53 = vadd.f32 %v1884_v50, %v985_v52  ;;  %v1963_v59 = vpop.f32.mrb[10].mxu1  ;;  %v2402_v52 = vld [vmem:[%s3202_s5 + $0x10] ss:$0 sps:$4 sm:$0x33]  }
 0x26d   : > { %v988_v54 = vpop.f32.mrb[11].mxu1  ;;  %v2876_v57 = vadd.f32 %v1963_v59, %v1884_v50  ;;  %v1018_v58 = vmax.f32 %v2871_v38, 0.0  ;;  %1994 = vmatprep.subr.msk.bf16.mxu0 %vm1527_vm13, %v2402_v52 }
 0x26e   : > { %v1016_v55 = vmax.f32 %v2869_v53, 0.0  ;;  %v2874_v56 = vadd.f32 %v1884_v50, %v988_v54  ;;  %v1529_v54 = vsel %vm1527_vm13, %v2402_v52, 0 }
 0x26f   : > { %v1019_v60 = vmax.f32 %v2876_v57, 0.0  ;;  %1973 = vmatpush3.bf16.msra.mxu0 %v1529_v54 }
 0x270   : > { %v1017_v6 = vmax.f32 %v2874_v56, 0.0  ;;  %1054 = vrot.lane.b32.xlu0 %v1016_v55, %s2476_s17 }
 0x272   : > { %1056 = vrot.lane.b32.xlu1 %v1017_v6, %s2476_s17 }
 0x274   : > { %1058 = vrot.lane.b32.xlu0 %v1018_v58, %s2476_s17 }
 0x276   : > { %1060 = vrot.lane.b32.xlu1 %v1019_v60, %s2476_s17 }
 0x287   : > { %v1966_v61 = vpop.f32.mrb[12].mxu1 }
 0x288   : > { %v1001_v62 = vpop.f32.mrb[13].mxu1  ;;  %v2891_v2 = vadd.f32 %v1966_v61, %v1884_v50 }
 0x289   : > { %v2889_v63 = vadd.f32 %v1884_v50, %v1001_v62  ;;  %v1967_v0 = vpop.f32.mrb[14].mxu1 }
 0x28a   : > { %v1004_v1 = vpop.f32.mrb[15].mxu1  ;;  %v2896_v7 = vadd.f32 %v1967_v0, %v1884_v50  ;;  %v1022_v10 = vmax.f32 %v2891_v2, 0.0  ;;  %v1902_v2 = vld [vmem:[%s3205_s8] ss:$0 sm:$0xff] }
 0x28b   : > { %v1020_v4 = vmax.f32 %v2889_v63, 0.0  ;;  %v2894_v5 = vadd.f32 %v1884_v50, %v1004_v1 }
 0x28c   : > { %v1023_v12 = vmax.f32 %v2896_v7, 0.0 }
 0x28d   : > { %v1021_v8 = vmax.f32 %v2894_v5, 0.0  ;;  %1062 = vrot.lane.b32.xlu0 %v1020_v4, %s2476_s17 }
 0x28f   : > { %1064 = vrot.lane.b32.xlu1 %v1021_v8, %s2476_s17 }
 0x291   : > { %1066 = vrot.lane.b32.xlu0 %v1022_v10, %s2476_s17 }
 0x293   : > { %1068 = vrot.lane.b32.xlu1 %v1023_v12, %s2476_s17 }
 0x2e2   : > { %v1055_v13 = vpop.permute.xlu0 %1054 }
 0x2e3   : > { %1079 = vst.msk [vmem:[#allocation3 + $0x11] sm:$0xff] %vm1024_vm11, %v1055_v13 }
 0x2e4   : > { %v1057_v47 = vpop.permute.xlu1 %1056 }
 0x2e5   : > { %1080 = vst.msk [vmem:[#allocation3 + $0x21] sm:$0xff] %vm1024_vm11, %v1057_v47 }
 0x2e6   : > { %v1059_v3 = vpop.permute.xlu0 %1058 }
 0x2e7   : > { %1081 = vst.msk [vmem:[#allocation3 + $0x31] sm:$0xff] %vm1024_vm11, %v1059_v3 }
 0x2e8   : > { %v1061_v15 = vpop.permute.xlu1 %1060 }
 0x2e9   : > { %1082 = vst.msk [vmem:[#allocation3 + $0x41] sm:$0xff] %vm1024_vm11, %v1061_v15 }
 0x2ea   : > { %v1096_v40 = vld [vmem:[#allocation3 + $0x11] sm:$0xff] }
 0x2eb   : > { %v2211_v45 = vpack.i.bf16 %v1096_v40, %v1095_v18  ;;  %v1104_v19 = vld [vmem:[#allocation3 + $0x12] sm:$0xff] }
 0x2ec   : > { %v2216_v20 = vpack.i.bf16 %v1104_v19, %v1103_v16  ;;  %v2918_v25 = vld [vmem:[#allocation3 + $0x20] sm:$0xff]  ;;  %v2923_v27 = vld [vmem:[#allocation3 + $0x10] sm:$0xff] }
 0x2ed   : > { %2212 = vrot.lane.b32.xlu0 %v2211_v45, %s2477_s21  ;;  %v2246_v30 = vpack.i.bf16 %v2918_v25, %v2923_v27  ;;  %v1120_v33 = vld [vmem:[#allocation3 + $0x21] sm:$0xff] }
 0x2ee   : > { %v2914_v22 = vld [vmem:[#allocation3 + $0x30] sm:$0xff]  ;;  %v2251_v36 = vpack.i.bf16 %v1120_v33, %v1096_v40  ;;  %v1128_v39 = vld [vmem:[#allocation3 + $0x22] sm:$0xff] }
 0x2ef   : > { %v1121_v32 = vld [vmem:[#allocation3 + $0x31] sm:$0xff]  ;;  %v2256_v43 = vpack.i.bf16 %v1128_v39, %v1104_v19  ;;  %v2261_v49 = vpack.i.bf16 %v2914_v22, %v2918_v25 }
 0x2f0   : > { %v2916_v24 = vld [vmem:[#allocation3 + $0x40] sm:$0xff]  ;;  %v1129_v37 = vld [vmem:[#allocation3 + $0x32] sm:$0xff]  ;;  %v2236_v44 = vpack.i.bf16 %v1121_v32, %v1120_v33 }
 0x2f1   : > { %2217 = vrot.lane.b32.xlu0 %v2216_v20, %s2469_s16  ;;  %v2221_v26 = vpack.i.bf16 %v2916_v24, %v2914_v22  ;;  %v1122_v29 = vld [vmem:[#allocation3 + $0x41] sm:$0xff]  ;;  %v2241_v51 = vpack.i.bf16 %v1129_v37, %v1128_v39 }
 0x2f2   : > { %v2226_v34 = vpack.i.bf16 %v1122_v29, %v1121_v32  ;;  %v1130_v35 = vld [vmem:[#allocation3 + $0x42] sm:$0xff] }
 0x2f3   : > { %2222 = vrot.lane.b32.xlu1 %v2221_v26, %s2478_s24  ;;  %v2231_v41 = vpack.i.bf16 %v1130_v35, %v1129_v37  ;;  %v1143_v37 = vld [vmem:[#allocation3 + $0x90] sm:$0xff] }
 0x2f5   : > { %2247 = vrot.lane.b32.xlu0 %v2246_v30, %s2478_s24 }
 0x2f7   : > { %2227 = vrot.lane.b32.xlu1 %v2226_v34, %s2468_s14 }
 0x2f9   : > { %2252 = vrot.lane.b32.xlu0 %v2251_v36, %s2468_s14 }
 0x2fb   : > { %2232 = vrot.lane.b32.xlu1 %v2231_v41, %s2479_s27 }
 0x2fd   : > { %2257 = vrot.lane.b32.xlu0 %v2256_v43, %s2479_s27 }
 0x2ff   : > { %2237 = vrot.lane.b32.xlu1 %v2236_v44, %s2477_s21  ;;  %v1063_v48 = vpop.permute.xlu0 %1062 }
 0x300   : > { %1083 = vst.msk [vmem:[#allocation3 + $0x51] sm:$0xff] %vm1024_vm11, %v1063_v48  ;;  %v1159_v48 = vld [vmem:[#allocation3 + $0x92] sm:$0xff] }
 0x301   : > { %v1065_v50 = vpop.permute.xlu1 %1064  ;;  %2262 = vrot.lane.b32.xlu0 %v2261_v49, %s2470_s22 }
 0x302   : > { %1084 = vst.msk [vmem:[#allocation3 + $0x61] sm:$0xff] %vm1024_vm11, %v1065_v50 }
 0x303   : > { %2242 = vrot.lane.b32.xlu1 %v2241_v51, %s2469_s16  ;;  %v1067_v59 = vpop.permute.xlu0 %1066 }
 0x304   : > { %1085 = vst.msk [vmem:[#allocation3 + $0x71] sm:$0xff] %vm1024_vm11, %v1067_v59 }
 0x305   : > { %v1069_v61 = vpop.permute.xlu1 %1068  ;;  %2267 = vrot.lane.b32.xlu0 %v2236_v44, %s2480_s26  ;;  %v1151_v44 = vld [vmem:[#allocation3 + $0x91] sm:$0xff] }
 0x306   : > { %1086 = vst.msk [vmem:[#allocation3 + $0x81] sm:$0xff] %vm1024_vm11, %v1069_v61 }
 0x307   : > { %v2952_v62 = vld [vmem:[#allocation3 + $0x50] sm:$0xff] }
 0x308   : > { %v2276_v0 = vpack.i.bf16 %v2952_v62, %v2916_v24  ;;  %v1155_v1 = vld [vmem:[#allocation3 + $0x52] sm:$0xff] }
 0x309   : > { %2272 = vrot.lane.b32.xlu0 %v2241_v51, %s2471_s23  ;;  %v1147_v13 = vld [vmem:[#allocation3 + $0x51] sm:$0xff]  ;;  %v2291_v47 = vpack.i.bf16 %v1155_v1, %v1130_v35  ;;  %v2960_v15 = vld [vmem:[#allocation3 + $0x60] sm:$0xff] }
 0x30a   : > { %2277 = vrot.lane.b32.xlu1 %v2276_v0, %s2470_s22  ;;  %v2281_v3 = vpack.i.bf16 %v1147_v13, %v1122_v29  ;;  %v2336_v40 = vpack.i.bf16 %v2960_v15, %v2952_v62  ;;  %v1124_v19 = vld [vmem:[#allocation3 + $0x61] sm:$0xff] }
 0x30b   : > { %v2966_v45 = vld [vmem:[#allocation3 + $0x70] sm:$0xff]  ;;  %v2341_v26 = vpack.i.bf16 %v1124_v19, %v1147_v13  ;;  %v1132_v32 = vld [vmem:[#allocation3 + $0x62] sm:$0xff] }
 0x30c   : > { %v1125_v29 = vld [vmem:[#allocation3 + $0x71] sm:$0xff]  ;;  %v2346_v34 = vpack.i.bf16 %v1132_v32, %v1155_v1  ;;  %v2351_v39 = vpack.i.bf16 %v2966_v45, %v2960_v15 }
 0x30d   : > { %2292 = vrot.lane.b32.xlu0 %v2291_v47, %s2471_s23  ;;  %v1118_v18 = vld [vmem:[#allocation3 + $0x80] sm:$0xff]  ;;  %v1133_v35 = vld [vmem:[#allocation3 + $0x72] sm:$0xff]  ;;  %v2356_v42 = vpack.i.bf16 %v1125_v29, %v1124_v19 }
 0x30e   : > { %2282 = vrot.lane.b32.xlu1 %v2281_v3, %s2480_s26  ;;  %v2301_v16 = vpack.i.bf16 %v1118_v18, %v2966_v45  ;;  %v1126_v20 = vld [vmem:[#allocation3 + $0x81] sm:$0xff]  ;;  %v2316_v41 = vpack.i.bf16 %v1143_v37, %v1118_v18  ;;  %v2361_v43 = vpack.i.bf16 %v1133_v35, %v1132_v32 }
 0x30f   : > { %v2306_v30 = vpack.i.bf16 %v1126_v20, %v1125_v29  ;;  %v1134_v33 = vld [vmem:[#allocation3 + $0x82] sm:$0xff]  ;;  %v2331_v46 = vpack.i.bf16 %v1151_v44, %v1126_v20 }
 0x310   : > { %v2311_v36 = vpack.i.bf16 %v1134_v33, %v1133_v35  ;;  %v2366_v49 = vpack.i.bf16 %v1159_v48, %v1134_v33 }
 0x311   : > { %2297 = vrot.lane.b32.xlu0 %v2291_v47, %s2469_s16 }
 0x312   : > { %2287 = vrot.lane.b32.xlu1 %v2281_v3, %s2477_s21  ;;  %v1087_v3 = vld [vmem:[#allocation3] sm:$0xff] }
 0x315   : > { %2337 = vrot.lane.b32.xlu0 %v2336_v40, %s2478_s24 }
 0x316   : > { %2302 = vrot.lane.b32.xlu1 %v2301_v16, %s2478_s24 }
 0x319   : > { %2342 = vrot.lane.b32.xlu0 %v2341_v26, %s2468_s14 }
 0x31a   : > { %2307 = vrot.lane.b32.xlu1 %v2306_v30, %s2468_s14 }
 0x31d   : > { %2347 = vrot.lane.b32.xlu0 %v2346_v34, %s2479_s27 }
 0x31e   : > { %2312 = vrot.lane.b32.xlu1 %v2311_v36, %s2479_s27  ;;  %s2481_s27 = smov 120  }
 0x321   : > { %2352 = vrot.lane.b32.xlu0 %v2351_v39, %s2470_s22 }
 0x322   : > { %2317 = vrot.lane.b32.xlu1 %v2316_v41, %s2470_s22 }
 0x325   : > { %2357 = vrot.lane.b32.xlu0 %v2356_v42, %s2480_s26 }
 0x326   : > { %2322 = vrot.lane.b32.xlu1 %v2356_v42, %s2477_s21 }
 0x329   : > { %2362 = vrot.lane.b32.xlu0 %v2361_v43, %s2471_s23 }
 0x32a   : > { %2327 = vrot.lane.b32.xlu1 %v2361_v43, %s2469_s16 }
 0x32e   : > { %2332 = vrot.lane.b32.xlu1 %v2331_v46, %s2480_s26  ;;  %s1913_s26 = sshll.u32 %s2555_s13, 10 }
 0x32f   : > { %s3143_s24 = scalar_lea.hbm %s3206_s9, %s1913_s26 }
 0x332   : > { %2367 = vrot.lane.b32.xlu1 %v2366_v49, %s2471_s23 }
 0x35f   : > { %v2213_v50 = vpop.permute.xlu0 %2212 }
 0x360   : > { %v2215_v1 = vunpack.i.h.bf16 %v2213_v50  ;;  %v2214_v13 = vunpack.i.l.bf16 %v2213_v50 }
 0x362   : > { %v1417_v19 = vsel %vm1024_vm11, %v2923_v27, %v2215_v1  ;;  %v1416_v20 = vsel %vm1024_vm11, %v1087_v3, %v2214_v13 }
 0x363   : > { %v2218_v51 = vpop.permute.xlu0 %2217 }
 0x364   : > { %v2220_v18 = vunpack.i.h.bf16 %v2218_v51  ;;  %v2219_v40 = vunpack.i.l.bf16 %v2218_v51 }
 0x365   : > { %v2223_v52 = vpop.permute.xlu1 %2222 }
 0x366   : > { %v1424_v32 = vsel %vm368_vm1, %v1416_v20, %v2219_v40  ;;  %v1425_v33 = vsel %vm368_vm1, %v1417_v19, %v2220_v18  ;;  %v2225_v34 = vunpack.i.h.bf16 %v2223_v52  ;;  %v2224_v35 = vunpack.i.l.bf16 %v2223_v52 }
 0x367   : > { %v2248_v59 = vpop.permute.xlu0 %2247 }
 0x368   : > { %v2250_v36 = vunpack.i.h.bf16 %v2248_v59  ;;  %v2249_v37 = vunpack.i.l.bf16 %v2248_v59 }
 0x369   : > { %v2228_v54 = vpop.permute.xlu1 %2227 }
 0x36a   : > { %v1434_v13 = vsel %vm1432_vm14, %v1425_v33, %v2250_v36  ;;  %v2229_v19 = vunpack.i.l.bf16 %v2228_v54 }
 0x36b   : > { %v2253_v61 = vpop.permute.xlu0 %2252 }
 0x36c   : > { %v2255_v41 = vunpack.i.h.bf16 %v2253_v61  ;;  %v2254_v42 = vunpack.i.l.bf16 %v2253_v61  ;;  %v1433_v61 = vsel %vm1432_vm14, %v1424_v32, %v2249_v37 }
 0x36d   : > { %v2985_v0 = vpop.permute.xlu1 %2232 }
 0x36f   : > { %v2258_v47 = vpop.permute.xlu0 %2257 }
 0x370   : > { %v2260_v44 = vunpack.i.h.bf16 %v2258_v47  ;;  %v2259_v46 = vunpack.i.l.bf16 %v2258_v47  ;;  %v1441_v47 = vsel %vm825_vm3, %v1433_v61, %v2254_v42 }
 0x371   : > { %v2238_v16 = vpop.permute.xlu1 %2237 }
 0x372   : > { %v2240_v26 = vunpack.i.h.bf16 %v2238_v16  ;;  %v2239_v29 = vunpack.i.l.bf16 %v2238_v16  ;;  %v2230_v16 = vunpack.i.h.bf16 %v2228_v54  ;;  %v1450_v20 = vsel %vm1449_vm15, %v1441_v47, %v2259_v46 }
 0x373   : > { %v2263_v30 = vpop.permute.xlu0 %2262  ;;  %v2234_v46 = vunpack.i.l.bf16 %v2985_v0 }
 0x374   : > { %v1418_v48 = vsel %vm1024_vm11, %v2918_v25, %v2239_v29  ;;  %v1419_v49 = vsel %vm1024_vm11, %v2914_v22, %v2240_v26  ;;  %v2265_v51 = vunpack.i.h.bf16 %v2263_v30  ;;  %v2264_v1 = vunpack.i.l.bf16 %v2263_v30 }
 0x375   : > { %v2243_v39 = vpop.permute.xlu1 %2242  ;;  %v1442_v25 = vsel %vm825_vm3, %v1434_v13, %v2255_v41 }
 0x376   : > { %v2245_v43 = vunpack.i.h.bf16 %v2243_v39  ;;  %v2244_v27 = vunpack.i.l.bf16 %v2243_v39  ;;  %v1451_v26 = vsel %vm1449_vm15, %v1442_v25, %v2260_v44  ;;  %v1458_v30 = vsel %vm834_vm4, %v1450_v20, %v2264_v1 }
 0x377   : > { %v2268_v50 = vpop.permute.xlu0 %2267  ;;  %v1459_v32 = vsel %vm834_vm4, %v1451_v26, %v2265_v51  ;;  %v2235_v44 = vunpack.i.h.bf16 %v2985_v0 }
 0x378   : > { %v1426_v52 = vsel %vm368_vm1, %v1418_v48, %v2244_v27  ;;  %v1427_v59 = vsel %vm368_vm1, %v1419_v49, %v2245_v43  ;;  %v2270_v3 = vunpack.i.h.bf16 %v2268_v50  ;;  %v2269_v18 = vunpack.i.l.bf16 %v2268_v50 }
 0x379   : > { %v1435_v40 = vsel %vm1432_vm14, %v1426_v52, %v2224_v35  ;;  %v1436_v22 = vsel %vm1432_vm14, %v1427_v59, %v2225_v34 }
 0x37a   : > { %v1443_v39 = vsel %vm825_vm3, %v1435_v40, %v2229_v19  ;;  %v1444_v35 = vsel %vm825_vm3, %v1436_v22, %v2230_v16  ;;  %v1467_v34 = vsel %vm1466_vm2, %v1458_v30, %v2269_v18  ;;  %v1468_v54 = vsel %vm1466_vm2, %v1459_v32, %v2270_v3 }
 0x37b   : > { %v2273_v29 = vpop.permute.xlu0 %2272  ;;  %v1452_v51 = vsel %vm1449_vm15, %v1443_v39, %v2234_v46  ;;  %v1453_v1 = vsel %vm1449_vm15, %v1444_v35, %v2235_v44 }
 0x37c   : > { %v2275_v33 = vunpack.i.h.bf16 %v2273_v29  ;;  %v2274_v36 = vunpack.i.l.bf16 %v2273_v29  ;;  %v2278_v37 = vpop.permute.xlu1 %2277 }
 0x37d   : > { %v2280_v41 = vunpack.i.h.bf16 %v2278_v37  ;;  %v2279_v42 = vunpack.i.l.bf16 %v2278_v37 }
 0x37e   : > { %v1475_v43 = vsel %vm843_vm5, %v1467_v34, %v2274_v36  ;;  %v1476_v27 = vsel %vm843_vm5, %v1468_v54, %v2275_v33 }
 0x37f   : > { %v2293_v48 = vpop.permute.xlu0 %2292  ;;  %v1483_v49 = vpack.c.bf16 %v1476_v27, %v1475_v43  ;;  %v1461_v61 = vsel %vm834_vm4, %v1453_v1, %v2280_v41  ;;  %v1460_v13 = vsel %vm834_vm4, %v1452_v51, %v2279_v42 }
 0x380   : > { %v2283_v50 = vpop.permute.xlu1 %2282  ;;  %v2295_v3 = vunpack.i.h.bf16 %v2293_v48  ;;  %v2294_v18 = vunpack.i.l.bf16 %v2293_v48 }
 0x381   : > { %v2285_v52 = vunpack.i.h.bf16 %v2283_v50  ;;  %v2284_v59 = vunpack.i.l.bf16 %v2283_v50  ;;  %1974 = vmatprep.mubr.msk.bf16.mxu0 %vm1514_vm6, %v1483_v49 }
 0x383   : > { %v1469_v47 = vsel %vm1466_vm2, %v1460_v13, %v2284_v59  ;;  %v1470_v0 = vsel %vm1466_vm2, %v1461_v61, %v2285_v52  ;;  %v2298_v25 = vpop.permute.xlu0 %2297 }
 0x384   : > { %v2288_v40 = vpop.permute.xlu1 %2287  ;;  %v1477_v22 = vsel %vm843_vm5, %v1469_v47, %v2294_v18  ;;  %v1478_v16 = vsel %vm843_vm5, %v1470_v0, %v2295_v3  ;;  %v2300_v54 = vunpack.i.h.bf16 %v2298_v25  ;;  %v2299_v41 = vunpack.i.l.bf16 %v2298_v25 }
 0x385   : > { %v1484_v19 = vpack.c.bf16 %v1478_v16, %v1477_v22  ;;  %v2290_v32 = vunpack.i.h.bf16 %v2288_v40  ;;  %v2289_v33 = vunpack.i.l.bf16 %v2288_v40 }
 0x387   : > { %v2338_v20 = vpop.permute.xlu0 %2337  ;;  %1975 = vmatmul.mubr.msk.bf16.vlgmr.msra.gmra.mrb[0].mxu0 %vm1514_vm6, %v1484_v19  ;;  %v1420_v39 = vsel %vm1024_vm11, %v2916_v24, %v2289_v33  ;;  %v1421_v35 = vsel %vm1024_vm11, %v2952_v62, %v2290_v32 }
 0x388   : > { %v2303_v26 = vpop.permute.xlu1 %2302  ;;  %v2340_v43 = vunpack.i.h.bf16 %v2338_v20  ;;  %v2339_v27 = vunpack.i.l.bf16 %v2338_v20  ;;  %v1428_v44 = vsel %vm368_vm1, %v1420_v39, %v2299_v41  ;;  %v1429_v46 = vsel %vm368_vm1, %v1421_v35, %v2300_v54 }
 0x389   : > { %v2305_v52 = vunpack.i.h.bf16 %v2303_v26  ;;  %v2304_v22 = vunpack.i.l.bf16 %v2303_v26 }
 0x38a   : > { %v1437_v62 = vsel %vm1432_vm14, %v1428_v44, %v2339_v27  ;;  %v1438_v13 = vsel %vm1432_vm14, %v1429_v46, %v2340_v43 }
 0x38b   : > { %v2343_v29 = vpop.permute.xlu0 %2342 }
 0x38c   : > { %v3026_v30 = vpop.permute.xlu1 %2307  ;;  %v2345_v48 = vunpack.i.h.bf16 %v2343_v29  ;;  %v2344_v49 = vunpack.i.l.bf16 %v2343_v29 }
 0x38d   : > { %v2310_v16 = vunpack.i.h.bf16 %v3026_v30 }
 0x38e   : > { %v1445_v47 = vsel %vm825_vm3, %v1437_v62, %v2344_v49  ;;  %v1446_v0 = vsel %vm825_vm3, %v1438_v13, %v2345_v48  ;;  %v2309_v48 = vunpack.i.l.bf16 %v3026_v30 }
 0x38f   : > { %v2348_v36 = vpop.permute.xlu0 %2347 }
 0x390   : > { %v3028_v37 = vpop.permute.xlu1 %2312  ;;  %v2350_v50 = vunpack.i.h.bf16 %v2348_v36  ;;  %v2349_v51 = vunpack.i.l.bf16 %v2348_v36 }
 0x392   : > { %v1454_v19 = vsel %vm1449_vm15, %v1445_v47, %v2349_v51  ;;  %v1455_v20 = vsel %vm1449_vm15, %v1446_v0, %v2350_v50 }
 0x393   : > { %v2353_v34 = vpop.permute.xlu0 %2352 }
 0x394   : > { %v2318_v42 = vpop.permute.xlu1 %2317  ;;  %v2355_v24 = vunpack.i.h.bf16 %v2353_v34  ;;  %v2354_v59 = vunpack.i.l.bf16 %v2353_v34 }
 0x395   : > { %v2319_v62 = vunpack.i.l.bf16 %v2318_v42 }
 0x396   : > { %v1462_v32 = vsel %vm834_vm4, %v1454_v19, %v2354_v59  ;;  %v1463_v33 = vsel %vm834_vm4, %v1455_v20, %v2355_v24  ;;  %v2314_v24 = vunpack.i.l.bf16 %v3028_v37 }
 0x397   : > { %v2358_v1 = vpop.permute.xlu0 %2357 }
 0x398   : > { %v2323_v61 = vpop.permute.xlu1 %2322  ;;  %v2360_v3 = vunpack.i.h.bf16 %v2358_v1  ;;  %v2359_v18 = vunpack.i.l.bf16 %v2358_v1  ;;  %v2315_v1 = vunpack.i.h.bf16 %v3028_v37 }
 0x399   : > { %v2325_v25 = vunpack.i.h.bf16 %v2323_v61  ;;  %v2324_v40 = vunpack.i.l.bf16 %v2323_v61  ;;  %v2320_v61 = vunpack.i.h.bf16 %v2318_v42 }
 0x39a   : > { %v1471_v34 = vsel %vm1466_vm2, %v1462_v32, %v2359_v18  ;;  %v1472_v54 = vsel %vm1466_vm2, %v1463_v33, %v2360_v3  ;;  %v1894_v32 = vld [vmem:[%s3203_s6] ss:$0 sm:$0xff] }
 0x39b   : > { %v2363_v29 = vpop.permute.xlu0 %2362  ;;  %v1422_v43 = vsel %vm1024_vm11, %v2960_v15, %v2324_v40  ;;  %v1423_v27 = vsel %vm1024_vm11, %v2966_v45, %v2325_v25  ;;  %v1648_v33 = vld [vmem:[%s3204_s7] sm:$0xf] }
 0x39c   : > { %v2365_v36 = vunpack.i.h.bf16 %v2363_v29  ;;  %v2364_v39 = vunpack.i.l.bf16 %v2363_v29  ;;  %v2328_v35 = vpop.permute.xlu1 %2327  ;;  %1995 = vmatprep.subr.msk.bf16.mxu0 %vm381_vm0, %v1648_v33 }
 0x39d   : > { %v2330_v41 = vunpack.i.h.bf16 %v2328_v35  ;;  %v2329_v26 = vunpack.i.l.bf16 %v2328_v35 }
 0x39e   : > { %v1479_v44 = vsel %vm843_vm5, %v1471_v34, %v2364_v39  ;;  %v1480_v46 = vsel %vm843_vm5, %v1472_v54, %v2365_v36  ;;  %v1669_v39 = vsel %vm381_vm0, %v1648_v33, 0 }
 0x39f   : > { %v1485_v49 = vpack.c.bf16 %v1480_v46, %v1479_v44  ;;  %v1430_v50 = vsel %vm368_vm1, %v1422_v43, %v2329_v26  ;;  %v1431_v51 = vsel %vm368_vm1, %v1423_v27, %v2330_v41  ;;  %1983 = vmatpush3.bf16.msra.mxu0 %v1669_v39 }
 0x3a0   : > { %v1439_v15 = vsel %vm1432_vm14, %v1430_v50, %v2304_v22  ;;  %v1440_v59 = vsel %vm1432_vm14, %v1431_v51, %v2305_v52  ;;  %v2333_v45 = vpop.permute.xlu1 %2332 }
 0x3a1   : > { %v1447_v13 = vsel %vm825_vm3, %v1439_v15, %v2309_v48  ;;  %v1448_v30 = vsel %vm825_vm3, %v1440_v59, %v2310_v16  ;;  %1978 = vmatprep.mubr.msk.bf16.mxu0 %vm1514_vm6, %v1485_v49  ;;  %v2335_v3 = vunpack.i.h.bf16 %v2333_v45  ;;  %v2334_v18 = vunpack.i.l.bf16 %v2333_v45 }
 0x3a2   : > { %v1456_v47 = vsel %vm1449_vm15, %v1447_v13, %v2314_v24  ;;  %v1457_v0 = vsel %vm1449_vm15, %v1448_v30, %v2315_v1 }
 0x3a3   : > { %v1464_v37 = vsel %vm834_vm4, %v1456_v47, %v2319_v62  ;;  %v1465_v25 = vsel %vm834_vm4, %v1457_v0, %v2320_v61 }
 0x3a4   : > { %v2368_v52 = vpop.permute.xlu1 %2367  ;;  %v1473_v42 = vsel %vm1466_vm2, %v1464_v37, %v2334_v18  ;;  %v1474_v19 = vsel %vm1466_vm2, %v1465_v25, %v2335_v3 }
 0x3a5   : > { %v2370_v40 = vunpack.i.h.bf16 %v2368_v52  ;;  %v2369_v22 = vunpack.i.l.bf16 %v2368_v52 }
 0x3a7   : > { %v1481_v16 = vsel %vm843_vm5, %v1473_v42, %v2369_v22  ;;  %v1482_v20 = vsel %vm843_vm5, %v1474_v19, %v2370_v40 }
 0x3a8   : > { %v1486_v29 = vpack.c.bf16 %v1482_v20, %v1481_v16 }
 0x3aa   : > { %1979 = vmatmul.mubr.msk.bf16.gmra.mrb[4].mxu0 %vm1514_vm6, %v1486_v29 }
 0x45a   : > { %v1976_v36 = vpop.f32.mrb[0].mxu0 }
 0x45b   : > { %v1574_v35 = vadd.f32 %v1976_v36, %v1894_v32  ;;  %v1565_v34 = vpop.f32.mrb[1].mxu0 }
 0x45c   : > { %v1566_v54 = vadd.f32 %v1894_v32, %v1565_v34  ;;  %v1977_v41 = vpop.f32.mrb[2].mxu0 }
 0x45d   : > { %v1577_v26 = vadd.f32 %v1977_v41, %v1894_v32  ;;  %v1568_v43 = vpop.f32.mrb[3].mxu0  ;;  %v1598_v44 = vmax.f32 %v1574_v35, 0.0 }
 0x45e   : > { %v1569_v27 = vadd.f32 %v1894_v32, %v1568_v43  ;;  %v1596_v48 = vmax.f32 %v1566_v54, 0.0 }
 0x45f   : > { %v1599_v46 = vmax.f32 %v1577_v26, 0.0 }
 0x460   : > { %v1597_v49 = vmax.f32 %v1569_v27, 0.0 }
 0x461   : > { %v2376_v50 = vpack.i.bf16 %v1599_v46, %v1598_v44 }
 0x462   : > { %v2371_v51 = vpack.i.bf16 %v1597_v49, %v1596_v48 }
 0x463   : > { %2377 = vrot.lane.b32.xlu1 %v2376_v50, %s2477_s21 }
 0x464   : > { %2372 = vrot.lane.b32.xlu0 %v2371_v51, %s2477_s21 }
 0x47d   : > { %v1980_v1 = vpop.f32.mrb[4].mxu0 }
 0x47e   : > { %v1590_v24 = vadd.f32 %v1980_v1, %v1894_v32  ;;  %v1581_v15 = vpop.f32.mrb[5].mxu0 }
 0x47f   : > { %v1582_v59 = vadd.f32 %v1894_v32, %v1581_v15  ;;  %v1981_v45 = vpop.f32.mrb[6].mxu0 }
 0x480   : > { %v1593_v61 = vadd.f32 %v1981_v45, %v1894_v32  ;;  %v1584_v62 = vpop.f32.mrb[7].mxu0  ;;  %v1602_v30 = vmax.f32 %v1590_v24, 0.0 }
 0x481   : > { %v1585_v13 = vadd.f32 %v1894_v32, %v1584_v62  ;;  %v1600_v18 = vmax.f32 %v1582_v59, 0.0 }
 0x482   : > { %v1603_v3 = vmax.f32 %v1593_v61, 0.0 }
 0x483   : > { %v1601_v47 = vmax.f32 %v1585_v13, 0.0 }
 0x484   : > { %v2386_v0 = vpack.i.bf16 %v1603_v3, %v1602_v30 }
 0x485   : > { %v2381_v37 = vpack.i.bf16 %v1601_v47, %v1600_v18 }
 0x486   : > { %2387 = vrot.lane.b32.xlu1 %v2386_v0, %s2477_s21 }
 0x487   : > { %2382 = vrot.lane.b32.xlu0 %v2381_v37, %s2477_s21  ;;  %s323_s21 = sand.u32 1, %s2457_s10  }
 0x488   : > { %s1872_s17 = sshll.u32 %s323_s21, 6  ;;  %s3155_s13 = scalar_lea.sflag [#allocation5], %s323_s21 }
 0x489   : > { %s3126_s25 = scalar_lea.vmem [#allocation4], %s1872_s17  ;;  %s2409_s17 = scalar_lea.vmem %s2408_s29, 2048 }
 0x48a   : > { %1746 = vrot.lane.b32.xlu1 %v2647_v17, %s2481_s27  ;;  %s1806_s14 = sshll.u32 %s3126_s25, 4  ;;  %s3147_s14 = int_to_ptr.vmem [resolvable:$true] %s1806_s14 }
 0x48b   : > { %1744 = vrot.lane.b32.xlu0 %v2641_v11, %s2481_s27  ;;  %p2410_p0 = scmp.lt.s32.totalorder %s3147_s14, %s2408_s29 }
 0x48e   : > { %1750 = vrot.lane.b32.xlu1 %v2644_v14, %s2481_s27 }
 0x48f   : > { %1748 = vrot.lane.b32.xlu0 %v2639_v9, %s2481_s27 }
 0x492   : > { %1754 = vrot.lane.b32.xlu1 %v2663_v31, %s2481_s27 }
 0x493   : > { %1752 = vrot.lane.b32.xlu0 %v2657_v23, %s2481_s27 }
 0x496   : > { %1758 = vrot.lane.b32.xlu1 %v2660_v28, %s2481_s27 }
 0x497   : > { %1756 = vrot.lane.b32.xlu0 %v2655_v21, %s2481_s27  ;;  %s2403_s27 = scalar_lea.vmem %s3147_s14, 1024 }
 0x498   : > { %p2404_p11 = scmp.ne.s32.totalorder %s3147_s14, %s2403_s27  ;;  %p2411_p1 = scmp.lt.s32.totalorder %s2409_s17, %s2403_s27 }
 0x49a   : > { %p2405_p12 = pnand %p2404_p11, %p2572_p5  ;;  %p2412_p2 = por %p2411_p1, %p2410_p0 }
 0x49c   : > { %p2406_p13 = pneg %p2405_p12 }
 0x49e   : > { %p2413_p3 = pnand %p2412_p2, %p2406_p13 }
 0x4d5   : > { %v2378_v25 = vpop.permute.xlu1 %2377 }
 0x4d6   : > { %v2380_v52 = vunpack.i.h.bf16 %v2378_v25  ;;  %v2379_v40 = vunpack.i.l.bf16 %v2378_v25  ;;  %v2373_v22 = vpop.permute.xlu0 %2372 }
 0x4d7   : > { %v2375_v42 = vunpack.i.h.bf16 %v2373_v22  ;;  %v2374_v17 = vunpack.i.l.bf16 %v2373_v22 }
 0x4d8   : > { %v1639_v11 = vsel %vm1024_vm11, %v1019_v60, %v2380_v52  ;;  %v1638_v9 = vsel %vm1024_vm11, %v1018_v58, %v2379_v40 }
 0x4d9   : > { %v1637_v14 = vsel %vm1024_vm11, %v1017_v6, %v2375_v42  ;;  %v1636_v21 = vsel %vm1024_vm11, %v1016_v55, %v2374_v17  ;;  %v1645_v28 = vpack.c.bf16 %v1639_v11, %v1638_v9 }
 0x4da   : > { %v1644_v23 = vpack.c.bf16 %v1637_v14, %v1636_v21 }
 0x4dc   : > { %1984 = vmatprep.mubr.msk.bf16.mxu0 %vm368_vm1, %v1644_v23 }
 0x4dd   : > { %1985 = vmatmul.mubr.msk.bf16.vlgmr.msra.gmra.mrb[8].mxu0 %vm368_vm1, %v1645_v28 }
 0x4f8   : > { %v2388_v31 = vpop.permute.xlu1 %2387 }
 0x4f9   : > { %v2390_v57 = vunpack.i.h.bf16 %v2388_v31  ;;  %v2389_v38 = vunpack.i.l.bf16 %v2388_v31  ;;  %v2383_v60 = vpop.permute.xlu0 %2382 }
 0x4fa   : > { %v2385_v58 = vunpack.i.h.bf16 %v2383_v60  ;;  %v2384_v56 = vunpack.i.l.bf16 %v2383_v60 }
 0x4fb   : > { %v1643_v53 = vsel %vm1024_vm11, %v1023_v12, %v2390_v57  ;;  %v1642_v55 = vsel %vm1024_vm11, %v1022_v10, %v2389_v38 }
 0x4fc   : > { %v1641_v6 = vsel %vm1024_vm11, %v1021_v8, %v2385_v58  ;;  %v1640_v19 = vsel %vm1024_vm11, %v1020_v4, %v2384_v56  ;;  %v1647_v20 = vpack.c.bf16 %v1643_v53, %v1642_v55  ;;  %v1747_v12 = vpop.permute.xlu1 %1746 }
 0x4fd   : > { %v1646_v16 = vpack.c.bf16 %v1641_v6, %v1640_v19  ;;  %v1745_v7 = vpop.permute.xlu0 %1744 }
 0x4ff   : > { %1988 = vmatprep.mubr.msk.bf16.mxu0 %vm368_vm1, %v1646_v16 }
 0x500   : > { %1989 = vmatmul.mubr.msk.bf16.gmra.mrb[12].mxu0 %vm368_vm1, %v1647_v20  ;;  %v1751_v39 = vpop.permute.xlu1 %1750 }
 0x501   : > { %v1749_v10 = vpop.permute.xlu0 %1748 }
 0x504   : > { %v1755_v48 = vpop.permute.xlu1 %1754 }
 0x505   : > { %v1753_v46 = vpop.permute.xlu0 %1752 }
 0x508   : > { %v1759_v62 = vpop.permute.xlu1 %1758 }
 0x509   : > { %v1757_v1 = vpop.permute.xlu0 %1756 }
 0x5b0   : > { %v1986_v5 = vpop.f32.mrb[8].mxu0 }
 0x5b1   : > { %v1714_v8 = vadd.f32 %v1986_v5, %v1902_v2  ;;  %v1705_v63 = vpop.f32.mrb[9].mxu0 }
 0x5b2   : > { %v1706_v4 = vadd.f32 %v1902_v2, %v1705_v63  ;;  %v1987_v29 = vpop.f32.mrb[10].mxu0 }
 0x5b3   : > { %v1770_v32 = vadd.f32 %v1749_v10, %v1714_v8  ;;  %v1717_v33 = vadd.f32 %v1987_v29, %v1902_v2  ;;  %v1708_v36 = vpop.f32.mrb[11].mxu0 }
 0x5b4   : > { %v1768_v35 = vadd.f32 %v1745_v7, %v1706_v4  ;;  %v1709_v34 = vadd.f32 %v1902_v2, %v1708_v36 }
 0x5b5   : > { %v1778_v54 = vmax.f32 %v1770_v32, 0.0  ;;  %v1771_v41 = vadd.f32 %v1751_v39, %v1717_v33 }
 0x5b6   : > { %v1776_v26 = vmax.f32 %v1768_v35, 0.0  ;;  %v1769_v43 = vadd.f32 %v1747_v12, %v1709_v34 }
 0x5b7   : > { %1786 = vst.msk [vmem:[%s3126_s25 + $0x10] sm:$0xff] %vm825_vm3, %v1778_v54  ;;  %v1779_v27 = vmax.f32 %v1771_v41, 0.0 }
 0x5b8   : > { %1784 = vst.msk [vmem:[%s3126_s25] sm:$0xff] %vm825_vm3, %v1776_v26  ;;  %v1777_v44 = vmax.f32 %v1769_v43, 0.0 }
 0x5b9   : > { %1787 = vst.msk [vmem:[%s3126_s25 + $0x18] sm:$0xff] %vm825_vm3, %v1779_v27 }
 0x5ba   : > { %1785 = vst.msk [vmem:[%s3126_s25 + $0x8] sm:$0xff] %vm825_vm3, %v1777_v44 }
 0x5d3   : > { %v1990_v49 = vpop.f32.mrb[12].mxu0 }
 0x5d4   : > { %v1730_v50 = vadd.f32 %v1990_v49, %v1902_v2  ;;  %v1721_v51 = vpop.f32.mrb[13].mxu0 }
 0x5d5   : > { %v1722_v24 = vadd.f32 %v1902_v2, %v1721_v51  ;;  %v1991_v15 = vpop.f32.mrb[14].mxu0 }
 0x5d6   : > { %v1774_v59 = vadd.f32 %v1757_v1, %v1730_v50  ;;  %v1733_v45 = vadd.f32 %v1991_v15, %v1902_v2  ;;  %v1724_v61 = vpop.f32.mrb[15].mxu0 }
 0x5d7   : > { %v1772_v13 = vadd.f32 %v1753_v46, %v1722_v24  ;;  %v1725_v30 = vadd.f32 %v1902_v2, %v1724_v61 }
 0x5d8   : > { %v1782_v3 = vmax.f32 %v1774_v59, 0.0  ;;  %v1775_v18 = vadd.f32 %v1759_v62, %v1733_v45 }
 0x5d9   : > { %v1780_v47 = vmax.f32 %v1772_v13, 0.0  ;;  %v1773_v0 = vadd.f32 %v1755_v48, %v1725_v30 }
 0x5da   : > { %1790 = vst.msk [vmem:[%s3126_s25 + $0x30] sm:$0xff] %vm825_vm3, %v1782_v3  ;;  %v1783_v37 = vmax.f32 %v1775_v18, 0.0 }
 0x5db   : > { %1788 = vst.msk [vmem:[%s3126_s25 + $0x20] sm:$0xff] %vm825_vm3, %v1780_v47  ;;  %v1781_v25 = vmax.f32 %v1773_v0, 0.0 }
 0x5dc   : > { %1791 = vst.msk [vmem:[%s3126_s25 + $0x38] sm:$0xff] %vm825_vm3, %v1783_v37 }
 0x5dd   : > { %1789 = vst.msk [vmem:[%s3126_s25 + $0x28] sm:$0xff] %vm825_vm3, %v1781_v25 }
 0x5de   : > { %2416 = shalt.err (!%p2413_p3)
}
 0x5df   : > { %s2417_s21 = scalar_lea.hbm %s3143_s24, 1024  ;;  %s2421_s22 = scalar_lea.hbm %s3206_s9, 2048 }
 0x5e0   : > { %p2418_p4 = scmp.ne.s32.totalorder %s3143_s24, %s2417_s21  ;;  %p2422_p9 = scmp.lt.u32.totalorder %s3143_s24, %s3206_s9 }
 0x5e1   : > { %p2423_p10 = scmp.lt.u32.totalorder %s2421_s22, %s2417_s21  ;;  %p2425_p12 = scmp.lt.u32.totalorder %s2417_s21, %s3143_s24 }
 0x5e2   : > { %p2419_p7 = pnand %p2418_p4, %p2572_p5 }
 0x5e3   : > { %p2424_p11 = por %p2423_p10, %p2422_p9 }
 0x5e4   : > { %p2420_p8 = pneg %p2419_p7 }
 0x5e5   : > { %p2426_p13 = por %p2425_p12, %p2424_p11 }
 0x5e7   : > { %p2427_p0 = pnand %p2426_p13, %p2420_p8 }
 0x5e9   : > { %2430 = shalt.err (!%p2427_p0)
}
 0x5ea   : > { %s2483_s27 = smov 128  }
 0x5eb   : > { %1996 = dma.vmem_to_hbm [thread:$0]  (%p2572_p5), %s3147_s14, 1024, %s3143_s24, %s3155_s13, %s2483_s27, %s2483_s27, %s2469_s16  }
 0x5ec PF: > { %p2002_p1 = scmp.ge.s32.totalorder %s2465_s12, 2  ;;  %s1821_s29 = sand.u32 1, %s2453_s30  }
 0x5ed   : > { %s1822_s17 = scalar_lea.sflag [#allocation5], %s1821_s29 }
 0x5ee   : > { %p1999_p2 = pnand %p2002_p1, %p2576_p6 }
 0x5f0   : > { %2448 = dma.done.wait (!%p1999_p2), %s1822_s17, 1024  }
 0x5f1   : > { %2450 = vsyncadd (!%p1999_p2), %s1822_s17, 4294966272  ;;  %p19_p3 = scmp.ge.s32.totalorder %s2559_s15, 4   ;;  %s3209_s30 = smov %s2457_s10 }
 0x5f2   : > { %s3210_s10 = smov %s2461_s11  ;;  %s3211_s11 = smov %s2570_s18 }
 0x5f3   : > { %s3212_s12 = smov %s2559_s15  ;;  %21 = sbr.rel (!%p19_p3) target bundleno = 3 (0x3), region = 95 }
 0x5fa   :  { %1827 = vsyncpa [#allocation5], 1 }
 0x5fb   :  { %1829 = vsyncpa [#allocation5 + $0x1], 1 }

</bundles_post_ra>
